<compile_context>
chip_gen: v6e
topology: v6e:2x2x1
jax: 0.10.0
libtpu: 0.0.40
codegen_flags: <defaults>
</compile_context>

<pallas_src>
import math
import functools

import jax
import jax.numpy as jnp
import numpy as np
from jax import lax
from jax.experimental import pallas as pl
from jax.experimental.pallas import tpu as pltpu


# --------------------------------- utilities ----------------------------------


def _round_up(n, m):
    return ((n + m - 1) // m) * m


def _seq_tile_and_pad(n, pref):
    """Pick a sequence tile and padded length.

    tile is a multiple of 16 (bf16 sublane pack); if the sequence is actually tiled
    (tile < padded length) the tile is a multiple of 128 so transposed-K blocks stay
    lane-dense. Returns (tile, padded_n) with padded_n % tile == 0."""
    n16 = _round_up(n, 16)
    if n16 <= pref:
        return n16, n16
    t = max(128, (pref // 128) * 128)
    return t, _round_up(n, t)


def _pad_seq(x, n_pad):
    n = x.shape[1]
    if n_pad == n:
        return x
    return jnp.pad(x, ((0, 0), (0, n_pad - n), (0, 0)))


def _vmem_limit_bytes():
    """Generation-aware VMEM cap (60% of physical per-core VMEM, headroom for
    compiler-internal scratch)."""
    cap = 64 * 1024 * 1024  # conservative default = v7x per-core physical VMEM
    try:
        info_fn = getattr(pltpu, "get_tpu_info", None)
        if info_fn is not None:
            cap = int(getattr(info_fn(), "vmem_capacity_bytes", cap)) or cap
    except Exception:
        pass
    return int(cap * 0.6)


# --------------------------- kernel 1: fused QKV projection -------------------


def _proj_split_heads_kernel(x_ref, w_ref, *out_refs, heads, dim_head, kt_index):
    """x tile (1, tn, C) @ concatenated weight (C, n_out*inner) -> head-major outputs.

    Output `kt_index` (the K projection) is stored transposed as (heads, d, tn) so the
    attention kernel can use a plain NN dot and lane-dense K tiles."""
    inner = heads * dim_head
    xb = x_ref[0].astype(jnp.bfloat16)                                     # (tn, C)
    proj = jnp.dot(xb, w_ref[...], preferred_element_type=jnp.float32)     # (tn, n_out*inner)
    for oi, oref in enumerate(out_refs):                                   # static loops
        base = oi * inner
        if oi == kt_index:
            kt = proj[:, base:base + inner].T                              # (inner, tn) f32
            for hh in range(heads):
                oref[0, hh] = kt[hh * dim_head:(hh + 1) * dim_head, :].astype(jnp.bfloat16)
        else:
            # TODO(synk): for dim_head < 128 these column slices cross a vreg lane
            # boundary (relayout + masked stores); pad dim_head to 128 if it matters.
            for hh in range(heads):
                lo = base + hh * dim_head
                oref[0, hh] = proj[:, lo:lo + dim_head].astype(jnp.bfloat16)


def _project(x, w_cat, *, heads, dim_head, n_out, kt_index, tn):
    """Returns n_out arrays: output `kt_index` has shape (B, heads, d, N) (transposed K),
    all others have shape (B, heads, N, d). All bf16."""
    b, n, c = x.shape
    inner = heads * dim_head
    assert w_cat.shape == (c, n_out * inner)
    assert n % tn == 0

    kern = functools.partial(_proj_split_heads_kernel, heads=heads,
                             dim_head=dim_head, kt_index=kt_index)
    out_shape, out_specs = [], []
    for oi in range(n_out):
        if oi == kt_index:
            out_shape.append(jax.ShapeDtypeStruct((b, heads, dim_head, n), jnp.bfloat16))
            out_specs.append(pl.BlockSpec((1, heads, dim_head, tn),
                                          lambda bi, ni: (bi, 0, 0, ni)))
        else:
            out_shape.append(jax.ShapeDtypeStruct((b, heads, n, dim_head), jnp.bfloat16))
            out_specs.append(pl.BlockSpec((1, heads, tn, dim_head),
                                          lambda bi, ni: (bi, 0, ni, 0)))

    return pl.pallas_call(
        kern,
        grid=(b, n // tn),
        in_specs=[
            pl.BlockSpec((1, tn, c), lambda bi, ni: (bi, ni, 0)),
            # TODO(synk): for very large C * (n_out*inner) on v7x (64 MiB VMEM) this
            # resident weight is still double-buffered; single-buffer it
            # (pipeline_mode=pl.Buffered(1)) or block its columns.
            pl.BlockSpec((c, n_out * inner), lambda bi, ni: (0, 0)),
        ],
        out_specs=out_specs,
        out_shape=out_shape,
        compiler_params=pltpu.CompilerParams(
            dimension_semantics=("parallel", "parallel"),
            vmem_limit_bytes=_vmem_limit_bytes()),
    )(x, w_cat)


# ------------------ kernel 2: flash attention + fused output proj -------------


def _flash_attn_out_kernel(q_ref, kt_ref, v_ref, wo_ref, o_ref,
                           m_ref, l_ref, acc_ref, *, nk_valid, mask_kv):
    kv = pl.program_id(2)
    nkv = pl.num_programs(2)

    @pl.when(kv == 0)
    def _init():
        m_ref[...] = jnp.full_like(m_ref, -jnp.inf)
        l_ref[...] = jnp.zeros_like(l_ref)
        acc_ref[...] = jnp.zeros_like(acc_ref)

    q = q_ref[0]            # (H, tq, d) bf16 (softmax scale folded into Wq)
    kt = kt_ref[0]          # (H, d, tk) bf16 (K pre-transposed -> NN dot)
    v = v_ref[0]            # (H, tk, d) bf16

    s = jnp.einsum("hqd,hdk->hqk", q, kt,
                   preferred_element_type=jnp.float32)          # (H, tq, tk) f32

    if mask_kv:             # static flag; only compiled in when the KV length is padded
        tk = v_ref.shape[2]
        col = kv * tk + lax.broadcasted_iota(jnp.int32, s.shape, 2)
        s = jnp.where(col < nk_valid, s, -jnp.inf)

    # online softmax update, f32 statistics (v5e-safe)
    m_prev = m_ref[...]
    m_new = jnp.maximum(m_prev, jnp.max(s, axis=-1, keepdims=True))
    alpha = jnp.exp(m_prev - m_new)
    p = jnp.exp(s - m_new)
    l_ref[...] = alpha * l_ref[...] + jnp.sum(p, axis=-1, keepdims=True)
    acc_ref[...] = alpha * acc_ref[...] + jnp.einsum(
        "hqk,hkd->hqd", p.astype(jnp.bfloat16), v,
        preferred_element_type=jnp.float32)
    m_ref[...] = m_new

    @pl.when(kv == nkv - 1)
    def _finalize():
        # normalize, then ONE deep (tq, inner) @ (inner, C) output projection and a
        # single lane-dense store of the (tq, C) block (no per-head RMW of o_ref).
        n_heads = acc_ref.shape[0]
        attn = (acc_ref[...] * pl.reciprocal(l_ref[...], approx=True)
                ).astype(jnp.bfloat16)                          # (H, tq, d)
        attn2d = jnp.concatenate([attn[h] for h in range(n_heads)], axis=-1)  # (tq, inner)
        o_ref[0] = jnp.dot(attn2d, wo_ref[...],
                           preferred_element_type=jnp.float32).astype(o_ref.dtype)


def _flash_attention(q, kt, v, wo, *, out_dim, out_dtype, tq, tk, nk_valid):
    b, heads, nq_pad, d = q.shape
    nk_pad = kt.shape[3]
    inner = heads * d
    mask_kv = (nk_pad != nk_valid)

    kern = functools.partial(_flash_attn_out_kernel, nk_valid=nk_valid, mask_kv=mask_kv)
    return pl.pallas_call(
        kern,
        grid=(b, nq_pad // tq, nk_pad // tk),
        in_specs=[
            pl.BlockSpec((1, heads, tq, d), lambda bi, qi, kvi: (bi, 0, qi, 0)),
            pl.BlockSpec((1, heads, d, tk), lambda bi, qi, kvi: (bi, 0, 0, kvi)),
            pl.BlockSpec((1, heads, tk, d), lambda bi, qi, kvi: (bi, 0, kvi, 0)),
            # TODO(synk): for very large inner*C on v7x consider pl.Buffered(1) on this
            # resident Wo block (or block its columns) to keep a single VMEM copy.
            pl.BlockSpec((inner, out_dim), lambda bi, qi, kvi: (0, 0)),
        ],
        out_specs=pl.BlockSpec((1, tq, out_dim), lambda bi, qi, kvi: (bi, qi, 0)),
        out_shape=jax.ShapeDtypeStruct((b, nq_pad, out_dim), out_dtype),
        scratch_shapes=[
            pltpu.VMEM((heads, tq, 1), jnp.float32),   # m (running max)
            pltpu.VMEM((heads, tq, 1), jnp.float32),   # l (running denom)
            pltpu.VMEM((heads, tq, d), jnp.float32),   # acc (running numerator)
        ],
        compiler_params=pltpu.CompilerParams(
            dimension_semantics=("parallel", "parallel", "arbitrary"),
            vmem_limit_bytes=_vmem_limit_bytes()),
    )(q, kt, v, wo)


# ----------------------------------- wrapper ----------------------------------


def flash_linear_cross_attention_pallas(x, params, *, heads, dim_head, context=None,
                                        block_q=256, block_kv=256):
    """x: (B, Nq, query_dim) f32. context: optional (B, Nk, context_dim).
    params: 'wq'/'wk'/'wv' of shape (inner, in_dim), 'wo' of shape (query_dim, inner)
    (PyTorch nn.Linear weight layout). Returns (B, Nq, query_dim)."""
    b, nq, c = x.shape
    scale = 1.0 / math.sqrt(dim_head)

    wq_t = params["wq"].T * scale                        # (C, inner), softmax scale folded in
    wk_t = params["wk"].T
    wv_t = params["wv"].T
    wo = params["wo"].T.astype(jnp.bfloat16)             # (inner, C)

    if context is None:
        # self-attention: fully fused QKV projection (single wide matmul)
        nk = nq
        t, n_pad = _seq_tile_and_pad(nq, min(block_q, block_kv))
        tq = tk = t
        nq_pad = nk_pad = n_pad
        x_p = _pad_seq(x, n_pad)
        w_qkv = jnp.concatenate([wq_t, wk_t, wv_t], axis=1).astype(jnp.bfloat16)
        q, kt, v = _project(x_p, w_qkv, heads=heads, dim_head=dim_head,
                            n_out=3, kt_index=1, tn=t)
    else:
        nk = context.shape[1]
        tq, nq_pad = _seq_tile_and_pad(nq, block_q)
        tk, nk_pad = _seq_tile_and_pad(nk, block_kv)
        x_p = _pad_seq(x, nq_pad)
        ctx_p = _pad_seq(context, nk_pad)
        (q,) = _project(x_p, wq_t.astype(jnp.bfloat16), heads=heads, dim_head=dim_head,
                        n_out=1, kt_index=-1, tn=tq)
        w_kv = jnp.concatenate([wk_t, wv_t], axis=1).astype(jnp.bfloat16)
        kt, v = _project(ctx_p, w_kv, heads=heads, dim_head=dim_head,
                         n_out=2, kt_index=0, tn=tk)

    # v7x megacore: only 'parallel' grid axes shard across the 2 TensorCores -- keep
    # at least 2 parallel grid slots when the problem allows it.
    while b * (nq_pad // tq) < 2 and tq % 32 == 0 and tq > 16:
        tq //= 2

    # TODO(synk): nn.Dropout(p) after to_out is identity at p=0 / inference; not modeled.
    out = _flash_attention(q, kt, v, wo, out_dim=c, out_dtype=x.dtype,
                           tq=tq, tk=tk, nk_valid=nk)
    return out[:, :nq, :] if nq_pad != nq else out


# ------------------------------ pure-JAX reference ----------------------------


def flash_linear_cross_attention_ref(x, context, params, *, heads, dim_head):
    if context is None:
        context = x
    b, nq, c = x.shape
    nk = context.shape[1]
    inner = heads * dim_head

    q = x @ params["wq"].T
    k = context @ params["wk"].T
    v = context @ params["wv"].T

    qh = jnp.transpose(q.reshape(b, nq, heads, dim_head), (0, 2, 1, 3))
    kh = jnp.transpose(k.reshape(b, nk, heads, dim_head), (0, 2, 1, 3))
    vh = jnp.transpose(v.reshape(b, nk, heads, dim_head), (0, 2, 1, 3))

    s = jnp.einsum("bhqd,bhkd->bhqk", qh, kh) / math.sqrt(dim_head)
    p = jax.nn.softmax(s, axis=-1)
    o = jnp.einsum("bhqk,bhkd->bhqd", p, vh)
    o = jnp.transpose(o, (0, 2, 1, 3)).reshape(b, nq, inner)
    return o @ params["wo"].T


# ------------------------------------ main -------------------------------------


if __name__ == "__main__":
    def make_params(key, c, heads, dim_head):
        inner = heads * dim_head
        kq, kk, kv_, ko = jax.random.split(key, 4)
        return {
            "wq": jax.random.normal(kq, (inner, c), dtype=jnp.float32) / math.sqrt(c),
            "wk": jax.random.normal(kk, (inner, c), dtype=jnp.float32) / math.sqrt(c),
            "wv": jax.random.normal(kv_, (inner, c), dtype=jnp.float32) / math.sqrt(c),
            "wo": jax.random.normal(ko, (c, inner), dtype=jnp.float32) / math.sqrt(inner),
        }

    key = jax.random.PRNGKey(0)
    k0, k1, k2, k3, k4 = jax.random.split(key, 5)

    # 1) self-attention (module default forward), divisible sequence length
    B, N, C, HEADS, DIM_HEAD = 2, 256, 128, 2, 128
    x = jax.random.normal(k0, (B, N, C), dtype=jnp.float32)
    params = make_params(k1, C, HEADS, DIM_HEAD)
    out = flash_linear_cross_attention_pallas(x, params, heads=HEADS, dim_head=DIM_HEAD)
    out = jax.block_until_ready(out)
    ref = flash_linear_cross_attention_ref(x, None, params, heads=HEADS, dim_head=DIM_HEAD)
    np.testing.assert_allclose(np.asarray(out), np.asarray(ref), rtol=3e-2, atol=3e-2)
    assert out.shape == (B, N, C)

    # 2) cross-attention with a ragged context length (exercises KV padding + masking
    #    and the multi-step online softmax: nk=400 -> two kv tiles of 256)
    ctx = jax.random.normal(k2, (B, 400, C), dtype=jnp.float32)
    out2 = flash_linear_cross_attention_pallas(x, params, context=ctx,
                                               heads=HEADS, dim_head=DIM_HEAD)
    out2 = jax.block_until_ready(out2)
    ref2 = flash_linear_cross_attention_ref(x, ctx, params, heads=HEADS, dim_head=DIM_HEAD)
    np.testing.assert_allclose(np.asarray(out2), np.asarray(ref2), rtol=3e-2, atol=3e-2)

    # 3) the module's default head shape (dim_head=64) at a small size
    B3, N3, C3, H3, D3 = 2, 160, 64, 4, 64
    x3 = jax.random.normal(k3, (B3, N3, C3), dtype=jnp.float32)
    params3 = make_params(k4, C3, H3, D3)
    out3 = flash_linear_cross_attention_pallas(x3, params3, heads=H3, dim_head=D3)
    out3 = jax.block_until_ready(out3)
    ref3 = flash_linear_cross_attention_ref(x3, None, params3, heads=H3, dim_head=D3)
    np.testing.assert_allclose(np.asarray(out3), np.asarray(ref3), rtol=3e-2, atol=3e-2)

    print("KERNEL_OK")
</pallas_src>

<mosaic_0001>
module attributes {stable_mosaic.version = 11 : i64} {
  func.func @_proj_split_heads_kernel(%arg0: i32, %arg1: i32, %arg2: memref<1x256x128xf32, #tpu.memory_space<vmem>>, %arg3: memref<128x768xbf16, #tpu.memory_space<vmem>>, %arg4: memref<1x2x256x128xbf16, #tpu.memory_space<vmem>>, %arg5: memref<1x2x128x256xbf16, #tpu.memory_space<vmem>>, %arg6: memref<1x2x256x128xbf16, #tpu.memory_space<vmem>>) attributes {dimension_semantics = [#tpu.dimension_semantics<parallel>, #tpu.dimension_semantics<parallel>], iteration_bounds = array<i64: 2, 1>, scalar_prefetch = 0 : i64, scratch_operands = 0 : i64, tpu.core_type = #tpu.core_type<tc>, window_params = [{transform_indices = @transform_0, window_bounds = array<i64: 1, 256, 128>}, {pipeline_mode = #tpu.pipeline_mode<synchronous>, transform_indices = @transform_1, window_bounds = array<i64: 128, 768>}, {transform_indices = @transform_2, window_bounds = array<i64: 1, 2, 256, 128>}, {transform_indices = @transform_3, window_bounds = array<i64: 1, 2, 128, 256>}, {transform_indices = @transform_4, window_bounds = array<i64: 1, 2, 256, 128>}]} {
    %c0 = arith.constant 0 : index
    %c0_0 = arith.constant 0 : index
    %c0_1 = arith.constant 0 : index
    %0 = vector.load %arg2[%c0, %c0_0, %c0_1] : memref<1x256x128xf32, #tpu.memory_space<vmem>>, vector<1x256x128xf32>
    %1 = vector.shape_cast %0 : vector<1x256x128xf32> to vector<256x128xf32>
    %2 = arith.truncf %1 : vector<256x128xf32> to vector<256x128xbf16>
    %c0_2 = arith.constant 0 : index
    %c0_3 = arith.constant 0 : index
    %3 = vector.load %arg3[%c0_2, %c0_3] : memref<128x768xbf16, #tpu.memory_space<vmem>>, vector<128x768xbf16>
    %cst = arith.constant dense<0.000000e+00> : vector<256x768xf32>
    %4 = tpu.matmul %2, %3, %cst {dimension_numbers = #tpu.dot_dimension_numbers<[1], [0], [0], [1], [0, 0, 1, 1], [], []>} : vector<256x128xbf16>, vector<128x768xbf16>, vector<256x768xf32> -> vector<256x768xf32>
    %5 = vector.extract_strided_slice %4 {offsets = [0, 0], sizes = [256, 128], strides = [1, 1]} : vector<256x768xf32> to vector<256x128xf32>
    %6 = arith.truncf %5 : vector<256x128xf32> to vector<256x128xbf16>
    %c0_4 = arith.constant 0 : index
    %c0_5 = arith.constant 0 : index
    %c0_6 = arith.constant 0 : index
    %c0_7 = arith.constant 0 : index
    %7 = vector.load %arg4[%c0_4, %c0_5, %c0_6, %c0_7] : memref<1x2x256x128xbf16, #tpu.memory_space<vmem>>, vector<1x1x256x128xbf16>
    %8 = vector.shape_cast %7 : vector<1x1x256x128xbf16> to vector<256x128xbf16>
    %9 = vector.shape_cast %6 : vector<256x128xbf16> to vector<1x1x256x128xbf16>
    tpu.vector_store %arg4[%c0_4, %c0_5, %c0_6, %c0_7], %9 {strides = array<i32>} : memref<1x2x256x128xbf16, #tpu.memory_space<vmem>>, vector<1x1x256x128xbf16>,
    %10 = vector.extract_strided_slice %4 {offsets = [0, 128], sizes = [256, 128], strides = [1, 1]} : vector<256x768xf32> to vector<256x128xf32>
    %11 = arith.truncf %10 : vector<256x128xf32> to vector<256x128xbf16>
    %c0_8 = arith.constant 0 : index
    %c1 = arith.constant 1 : index
    %c0_9 = arith.constant 0 : index
    %c0_10 = arith.constant 0 : index
    %12 = vector.load %arg4[%c0_8, %c1, %c0_9, %c0_10] : memref<1x2x256x128xbf16, #tpu.memory_space<vmem>>, vector<1x1x256x128xbf16>
    %13 = vector.shape_cast %12 : vector<1x1x256x128xbf16> to vector<256x128xbf16>
    %14 = vector.shape_cast %11 : vector<256x128xbf16> to vector<1x1x256x128xbf16>
    tpu.vector_store %arg4[%c0_8, %c1, %c0_9, %c0_10], %14 {strides = array<i32>} : memref<1x2x256x128xbf16, #tpu.memory_space<vmem>>, vector<1x1x256x128xbf16>,
    %15 = vector.extract_strided_slice %4 {offsets = [0, 256], sizes = [256, 256], strides = [1, 1]} : vector<256x768xf32> to vector<256x256xf32>
    %16 = tpu.transpose %15, [1, 0] : vector<256x256xf32> -> vector<256x256xf32>
    %17 = vector.extract_strided_slice %16 {offsets = [0, 0], sizes = [128, 256], strides = [1, 1]} : vector<256x256xf32> to vector<128x256xf32>
    %18 = arith.truncf %17 : vector<128x256xf32> to vector<128x256xbf16>
    %c0_11 = arith.constant 0 : index
    %c0_12 = arith.constant 0 : index
    %c0_13 = arith.constant 0 : index
    %c0_14 = arith.constant 0 : index
    %19 = vector.load %arg5[%c0_11, %c0_12, %c0_13, %c0_14] : memref<1x2x128x256xbf16, #tpu.memory_space<vmem>>, vector<1x1x128x256xbf16>
    %20 = vector.shape_cast %19 : vector<1x1x128x256xbf16> to vector<128x256xbf16>
    %21 = vector.shape_cast %18 : vector<128x256xbf16> to vector<1x1x128x256xbf16>
    tpu.vector_store %arg5[%c0_11, %c0_12, %c0_13, %c0_14], %21 {strides = array<i32>} : memref<1x2x128x256xbf16, #tpu.memory_space<vmem>>, vector<1x1x128x256xbf16>,
    %22 = vector.extract_strided_slice %16 {offsets = [128, 0], sizes = [128, 256], strides = [1, 1]} : vector<256x256xf32> to vector<128x256xf32>
    %23 = arith.truncf %22 : vector<128x256xf32> to vector<128x256xbf16>
    %c0_15 = arith.constant 0 : index
    %c1_16 = arith.constant 1 : index
    %c0_17 = arith.constant 0 : index
    %c0_18 = arith.constant 0 : index
    %24 = vector.load %arg5[%c0_15, %c1_16, %c0_17, %c0_18] : memref<1x2x128x256xbf16, #tpu.memory_space<vmem>>, vector<1x1x128x256xbf16>
    %25 = vector.shape_cast %24 : vector<1x1x128x256xbf16> to vector<128x256xbf16>
    %26 = vector.shape_cast %23 : vector<128x256xbf16> to vector<1x1x128x256xbf16>
    tpu.vector_store %arg5[%c0_15, %c1_16, %c0_17, %c0_18], %26 {strides = array<i32>} : memref<1x2x128x256xbf16, #tpu.memory_space<vmem>>, vector<1x1x128x256xbf16>,
    %27 = vector.extract_strided_slice %4 {offsets = [0, 512], sizes = [256, 128], strides = [1, 1]} : vector<256x768xf32> to vector<256x128xf32>
    %28 = arith.truncf %27 : vector<256x128xf32> to vector<256x128xbf16>
    %c0_19 = arith.constant 0 : index
    %c0_20 = arith.constant 0 : index
    %c0_21 = arith.constant 0 : index
    %c0_22 = arith.constant 0 : index
    %29 = vector.load %arg6[%c0_19, %c0_20, %c0_21, %c0_22] : memref<1x2x256x128xbf16, #tpu.memory_space<vmem>>, vector<1x1x256x128xbf16>
    %30 = vector.shape_cast %29 : vector<1x1x256x128xbf16> to vector<256x128xbf16>
    %31 = vector.shape_cast %28 : vector<256x128xbf16> to vector<1x1x256x128xbf16>
    tpu.vector_store %arg6[%c0_19, %c0_20, %c0_21, %c0_22], %31 {strides = array<i32>} : memref<1x2x256x128xbf16, #tpu.memory_space<vmem>>, vector<1x1x256x128xbf16>,
    %32 = vector.extract_strided_slice %4 {offsets = [0, 640], sizes = [256, 128], strides = [1, 1]} : vector<256x768xf32> to vector<256x128xf32>
    %33 = arith.truncf %32 : vector<256x128xf32> to vector<256x128xbf16>
    %c0_23 = arith.constant 0 : index
    %c1_24 = arith.constant 1 : index
    %c0_25 = arith.constant 0 : index
    %c0_26 = arith.constant 0 : index
    %34 = vector.load %arg6[%c0_23, %c1_24, %c0_25, %c0_26] : memref<1x2x256x128xbf16, #tpu.memory_space<vmem>>, vector<1x1x256x128xbf16>
    %35 = vector.shape_cast %34 : vector<1x1x256x128xbf16> to vector<256x128xbf16>
    %36 = vector.shape_cast %33 : vector<256x128xbf16> to vector<1x1x256x128xbf16>
    tpu.vector_store %arg6[%c0_23, %c1_24, %c0_25, %c0_26], %36 {strides = array<i32>} : memref<1x2x256x128xbf16, #tpu.memory_space<vmem>>, vector<1x1x256x128xbf16>,
    return
  }
  func.func @transform_0(%arg0: i32, %arg1: i32) -> (i32, i32, i32) {
    %c0_i32 = arith.constant 0 : i32
    %c0_i32_0 = arith.constant 0 : i32
    return %arg0, %arg1, %c0_i32 : i32, i32, i32
  }
  func.func @transform_1(%arg0: i32, %arg1: i32) -> (i32, i32) {
    %c0_i32 = arith.constant 0 : i32
    %c0_i32_0 = arith.constant 0 : i32
    %c0_i32_1 = arith.constant 0 : i32
    return %c0_i32, %c0_i32_0 : i32, i32
  }
  func.func @transform_2(%arg0: i32, %arg1: i32) -> (i32, i32, i32, i32) {
    %c0_i32 = arith.constant 0 : i32
    %c0_i32_0 = arith.constant 0 : i32
    %c0_i32_1 = arith.constant 0 : i32
    return %arg0, %c0_i32, %arg1, %c0_i32_0 : i32, i32, i32, i32
  }
  func.func @transform_3(%arg0: i32, %arg1: i32) -> (i32, i32, i32, i32) {
    %c0_i32 = arith.constant 0 : i32
    %c0_i32_0 = arith.constant 0 : i32
    %c0_i32_1 = arith.constant 0 : i32
    return %arg0, %c0_i32, %c0_i32_0, %arg1 : i32, i32, i32, i32
  }
  func.func @transform_4(%arg0: i32, %arg1: i32) -> (i32, i32, i32, i32) {
    %c0_i32 = arith.constant 0 : i32
    %c0_i32_0 = arith.constant 0 : i32
    %c0_i32_1 = arith.constant 0 : i32
    return %arg0, %c0_i32, %arg1, %c0_i32_0 : i32, i32, i32, i32
  }
}

</mosaic_0001>

<bundles_post_ra>
// kernel: tpu_custom_call.1
= control target key start
LH: loop header
LB: loop body
LE: loop exit
PB: predicated region body
PF: predicated region fallthrough
CT: control target
= control target key end

     0   :  { %s4467_s0 = inlined_call_operand.hbm [shape: f32[2,256,128], index: 0, kind: input, shape index: {}]   ;;  %s4468_s1 = inlined_call_operand.hbm [shape: bf16[128,768], index: 1, kind: input, shape index: {}]   ;;  %s4469_s2 = inlined_call_operand.hbm [shape: bf16[2,2,256,128], index: 2, kind: output, shape index: {0}]   ;;  %s4470_s3 = inlined_call_operand.hbm [shape: bf16[2,2,128,256], index: 3, kind: output, shape index: {1}]   ;;  %s4471_s4 = inlined_call_operand.hbm [shape: bf16[2,2,256,128], index: 4, kind: output, shape index: {2}]  }
   0x1   :  { %4474 = sst [smem:[#allocation15_spill]] %s4468_s1 }
   0x2   :  { %10 = vsyncpa [#allocation3], 0 }
   0x3   :  { %12 = vsyncpa [#allocation3 + $0x1], 0 }
   0x4   :  { %13 = vsyncpa [#allocation6], 0 }
   0x5   :  { %14 = vsyncpa [#allocation4], 0 }
   0x6   :  { %16 = vsyncpa [#allocation4 + $0x1], 0 }
   0x7   :  { %17 = vsyncpa [#allocation9], 0 }
   0x8   :  { %19 = vsyncpa [#allocation9 + $0x1], 0  ;;  %s3910_s15 = smov 0   ;;  %s3912_s16 = smov 0  }
   0x9   :  { %s3914_s17 = smov 0   ;;  %s3916_s18 = smov 0  }
   0xa   :  { %s3918_s19 = smov 0   ;;  %s3920_s20 = smov 0  }
   0xb LB: > { %s3941_s21 = sadd.s32 4294967295, %s3869_s20   ;;  %s4472_s22 = sadd.s32 4294967294, %s3869_s20   ;;  %s3869_s20 = sphi %s3920_s20, %s25_s20   ;;  %s3865_s19 = sphi %s3918_s19, %s4493_s19   ;;  %s3861_s18 = sphi %s3916_s18, %s4492_s18   ;;  %s3857_s17 = sphi %s3914_s17, %s4491_s17   ;;  %s3853_s16 = sphi %s3912_s16, %s4490_s16   ;;  %s3849_s15 = sphi %s3910_s15, %s4489_s15  }
   0xc   : > { %p59_p0 = scmp.ne.s32.totalorder %s3853_s16, %s3849_s15  ;;  %p4473_p1 = scmp.eq.s32.totalorder %s3941_s21, 0 }
   0xd   : > { %p112_p3 = scmp.eq.s32.totalorder %s4472_s22, 1  ;;  %p2414_p5 = scmp.ge.s32.totalorder %s3869_s20, 1 }
   0xe   : > { %p3952_p4 = por %p4473_p1, %p59_p0  ;;  %p175_p7 = scmp.lt.s32.totalorder %s3869_s20, 3 }
   0xf   : > { %p3957_p6 = por %p112_p3, %p59_p0  ;;  %s3871_s26 = smov [#allocation5]  }
  0x10   : > { %p3962_p8 = pnand %p2414_p5, %p175_p7  ;;  %s187_s27 = sshll.u32 %s3871_s26, 4  ;;  %s188_s27 = int_to_ptr.vmem [resolvable:$true] %s187_s27 }
  0x11   : > { %s4476_s24 = scalar_select %p3957_p6, 1, 0 }
  0x12   : > { %p3299_p9 = pneg %p3962_p8  ;;  %s37_s29 = sadd.s32 1, %s3865_s19 }
  0x13   : > { %s3686_s30 = scalar_lea.vmem %s188_s27, 6144  ;;  %p3694_p5 = scmp.lt.s32.totalorder %s188_s27, %s188_s27 }
  0x14   : > { %p3971_p11 = pnand %p3299_p9, %p4473_p1  ;;  %p3687_p13 = scmp.ne.s32.totalorder %s188_s27, %s3686_s30 }
  0x15   : > { %p3695_p7 = scmp.lt.s32.totalorder %s3686_s30, %s3686_s30 }
  0x16   : > { %p3677_p12 = pneg %p3971_p11 }
  0x17   : > { %p3696_p2 = por %p3695_p7, %p3694_p5 }
  0x18   : > { %p3689_p0 = pnand %p3687_p13, %p3677_p12 }
  0x1a   : > { %p3690_p3 = pneg %p3689_p0 }
  0x1c   : > { %p3697_p6 = pnand %p3696_p2, %p3690_p3 }
  0x1e   : > { %3700 = shalt.err (!%p3697_p6)
}
  0x1f   : > { %s3872_s5 = smov 384   ;;  %s3873_s6 = smov 24  }
  0x20   : > { %s4479_s1 = sld [smem:[#allocation15_spill]]  ;;  %p39_p2 = scmp.ge.s32.totalorder %s37_s29, 2 }
  0x21   : > { %s46_s9 = sadd.s32 1, %s3857_s17  ;;  %p53_p6 = scmp.ne.s32.totalorder %s3857_s17, %s3853_s16 }
  0x22   : > { %p54_p9 = scmp.eq.s32.totalorder %s3869_s20, 0  ;;  %s4495_s29 = smov (%p39_p2, %s37_s29), 0 }
  0x23   : > { %p4481_p13 = scmp.eq.s32.totalorder %s3941_s21, 1  ;;  %s41_s12 = ssub.s32 %s3865_s19, %s4495_s29 }
  0x24   : > { %p3989_p12 = por %p54_p9, %p53_p6  ;;  %p3318_p3 = scmp.lt.s32.totalorder %s3869_s20, 2 }
  0x25   : > { %p3995_p0 = por %p4481_p13, %p53_p6  ;;  %s201_s13 = sand.u32 1, %s3857_s17  }
  0x26   : > { %3302 = dma.hbm_to_vmem [thread:$0]  (!%p3971_p11), %s4479_s1, 6144, %s188_s27, [#allocation6], %s3872_s5, %s3872_s5, %s3873_s6  }
  0x27   : > { %p44_p11 = scmp.eq.s32.totalorder %s41_s12, 0  ;;  %s2417_s14 = sshll.u32 %s201_s13, 8 }
  0x28   : > { %s2725_s27 = sshll.u32 %s3865_s19, 12  ;;  %s205_s6 = scalar_lea.vmem [#allocation2], %s2417_s14 }
  0x29   : > { %s4004_s26 = scalar_select %p44_p11, %s3857_s17, %s46_s9  }
  0x2a   : > { %s213_s5 = scalar_lea.hbm %s4467_s0, %s2725_s27  ;;  %s214_s7 = sshll.u32 %s205_s6, 4  ;;  %s215_s7 = int_to_ptr.vmem [resolvable:$true] %s214_s7 }
  0x2b   : > { %p4012_p5 = pnand %p3318_p3, %p3989_p12  ;;  %s202_s22 = scalar_lea.sflag [#allocation3], %s201_s13 }
  0x2c   : > { %s3714_s12 = scalar_lea.vmem %s215_s7, 4096  ;;  %s3874_s9 = smov [#allocation2]  }
  0x2d   : > { %p3703_p7 = pneg %p4012_p5  ;;  %p3715_p2 = scmp.ne.s32.totalorder %s215_s7, %s3714_s12 }
  0x2e   : > { %s3719_s1 = sshll.u32 %s3874_s9, 4  ;;  %s3720_s1 = int_to_ptr.vmem [resolvable:$false] %s3719_s1 }
  0x2f   : > { %p3717_p6 = pnand %p3715_p2, %p3703_p7  ;;  %s3721_s27 = scalar_lea.vmem %s3720_s1, 8192 }
  0x30   : > { %p3722_p13 = scmp.lt.s32.totalorder %s215_s7, %s3720_s1  ;;  %p3723_p11 = scmp.lt.s32.totalorder %s3721_s27, %s3714_s12 }
  0x31   : > { %p3718_p9 = pneg %p3717_p6 }
  0x32   : > { %p3724_p10 = por %p3723_p11, %p3722_p13 }
  0x34   : > { %p3725_p1 = pnand %p3724_p10, %p3718_p9 }
  0x36   : > { %3728 = shalt.err (!%p3725_p1)
}
  0x37   : > { %s3875_s10 = smov 128   ;;  %s3876_s14 = smov 8  }
  0x38   : > { %3306 = dma.hbm_to_vmem [thread:$0]  (!%p4012_p5), %s213_s5, 4096, %s215_s7, %s202_s22, %s3875_s10, %s3875_s10, %s3876_s14  }
  0x39   : > { %226 = sbr.rel (%p3962_p8) target bundleno = 649 (0x289), region = 28  ;;  %s4023_s13 = sand.u32 (!%p3962_p8), 1, %s3853_s16  }
  0x3a   : > { %s4026_s28 = sshll.u32 (!%p3962_p8), %s4023_s13, 8  ;;  %s229_s1 = scalar_lea.sflag (!%p3962_p8), [#allocation3], %s4023_s13 }
  0x3b   : > { %s4030_s30 = scalar_lea.vmem (!%p3962_p8), [#allocation2], %s4026_s28 }
  0x3e   : > { %3832 = dma.done.wait (%p3952_p4), %s229_s1, 4096  }
  0x3f   : > { %3834 = vsyncadd (%p3952_p4), %s229_s1, 4294963200  ;;  %p4484_p1 = scmp.eq.s32.totalorder %s3941_s21, 0 }
  0x41   : > { %3836 = dma.done.wait (%p4484_p1), [#allocation6], 6144   ;;  %p4485_p8 = pmov %p4484_p1 }
  0x42   : > { %v3877_v0 = vmov 0   ;;  %v3603_v1 = vld [vmem:[#allocation5 + $0x154] ss:$24 sps:$4 sm:$0xff]   ;;  %v3605_v2 = vld [vmem:[#allocation5 + $0x150] ss:$24 sps:$4 sm:$0xff]   ;;  %v292_v17 = vld [vmem:[%s4030_s30 + $0x80] sm:$0xff] }
  0x43   : > { %3838 = vsyncadd (%p4485_p8), [#allocation6], 4294961152  ;;  %724 = vmatprep.mubr.bf16.mxu1 %v3877_v0  ;;  %644 = vmatprep.mubr.bf16.mxu0 %v3877_v0  ;;  %v3606_v3 = vld [vmem:[#allocation5 + $0x124] ss:$24 sps:$4 sm:$0xff]   ;;  %v3608_v4 = vld [vmem:[#allocation5 + $0x120] ss:$24 sps:$4 sm:$0xff]  }
  0x44   : > { %3271 = vmatprep.subr.bf16.mxu1 %v3603_v1  ;;  %612 = vmatprep.subr.bf16.mxu0 %v3603_v1  ;;  %v3609_v5 = vld [vmem:[#allocation5 + $0xf4] ss:$24 sps:$4 sm:$0xff]   ;;  %v3611_v6 = vld [vmem:[#allocation5 + $0xf0] ss:$24 sps:$4 sm:$0xff]   ;;  %v3612_v7 = vld [vmem:[#allocation5 + $0xc4] ss:$24 sps:$4 sm:$0xff]  }
  0x45   : > { %3279 = vmatpush1.bf16.msra.mxu1 %v3605_v2  ;;  %613 = vmatpush1.bf16.msra.mxu0 %v3605_v2  ;;  %v3614_v8 = vld [vmem:[#allocation5 + $0xc0] ss:$24 sps:$4 sm:$0xff]   ;;  %v3615_v9 = vld [vmem:[#allocation5 + $0x94] ss:$24 sps:$4 sm:$0xff]   ;;  %v3617_v10 = vld [vmem:[#allocation5 + $0x90] ss:$24 sps:$4 sm:$0xff]  }
  0x46   : > { %3272 = vmatprep.subr.bf16.mxu1 %v3606_v3  ;;  %614 = vmatprep.subr.bf16.mxu0 %v3606_v3  ;;  %v3618_v11 = vld [vmem:[#allocation5 + $0x64] ss:$24 sps:$4 sm:$0xff]   ;;  %v3620_v12 = vld [vmem:[#allocation5 + $0x60] ss:$24 sps:$4 sm:$0xff]   ;;  %v3621_v13 = vld [vmem:[#allocation5 + $0x34] ss:$24 sps:$4 sm:$0xff]  }
  0x47   : > { %v3623_v14 = vld [vmem:[#allocation5 + $0x30] ss:$24 sps:$4 sm:$0xff]   ;;  %v3624_v15 = vld [vmem:[#allocation5 + $0x4] ss:$24 sps:$4 sm:$0xff]   ;;  %v3626_v16 = vld [vmem:[#allocation5] ss:$24 sps:$4 sm:$0xff]  }
  0x48   : > { %v293_v18 = vld [vmem:[%s4030_s30 + $0x88] sm:$0xff]  ;;  %v3629_v19 = vld [vmem:[#allocation5 + $0x15c] ss:$24 sps:$4 sm:$0xff]   ;;  %v276_v20 = vld [vmem:[%s4030_s30] sm:$0xff]  ;;  %s4186_s22 = scalar_lea.vmem [#allocation7], %s4026_s28  ;;  %s4221_s23 = scalar_lea.vmem [#allocation10], %s4026_s28 }
  0x49   : > { %3280 = vmatpush1.bf16.msra.mxu1 %v3608_v4  ;;  %615 = vmatpush1.bf16.msra.mxu0 %v3608_v4  ;;  %v277_v21 = vld [vmem:[%s4030_s30 + $0x8] sm:$0xff]  ;;  %v4046_v22 = vpack.c.bf16 %v293_v18, %v292_v17  ;;  %v3627_v23 = vld [vmem:[#allocation5 + $0x158] ss:$24 sps:$4 sm:$0xff]   ;;  %v3635_v29 = vld [vmem:[#allocation5 + $0xfc] ss:$24 sps:$4 sm:$0xff]   ;;  %s4256_s25 = sshll.u32 %s3861_s18, 12 }
  0x4a   : > { %3273 = vmatprep.subr.bf16.mxu1 %v3609_v5  ;;  %616 = vmatprep.subr.bf16.mxu0 %v3609_v5  ;;  %v3632_v24 = vld [vmem:[#allocation5 + $0x12c] ss:$24 sps:$4 sm:$0xff]   ;;  %v4048_v25 = vpack.c.bf16 %v277_v21, %v276_v20  ;;  %v294_v26 = vld [vmem:[%s4030_s30 + $0x90] sm:$0xff]  ;;  %v295_v27 = vld [vmem:[%s4030_s30 + $0x98] sm:$0xff]  ;;  %s4262_s7 = scalar_lea.hbm %s4469_s2, %s4256_s25  ;;  %s2212_s8 = sshll.u32 %s4186_s22, 4  ;;  %s4265_s8 = int_to_ptr.vmem [resolvable:$true] %s2212_s8 }
  0x4b   : > { %v3630_v28 = vld [vmem:[#allocation5 + $0x128] ss:$24 sps:$4 sm:$0xff]   ;;  %v3653_v31 = vld [vmem:[#allocation5 + $0x164] ss:$24 sps:$4 sm:$0xff]   ;;  %v278_v32 = vld [vmem:[%s4030_s30 + $0x10] sm:$0xff]  ;;  %v4058_v34 = vpack.c.bf16 %v295_v27, %v294_v26  ;;  %s2187_s12 = scalar_lea.sflag [#allocation4], %s4023_s13 }
  0x4c   : > { %v3651_v30 = vld [vmem:[#allocation5 + $0x160] ss:$24 sps:$4 sm:$0xff]   ;;  %v3638_v36 = vld [vmem:[#allocation5 + $0xcc] ss:$24 sps:$4 sm:$0xff]   ;;  %v3654_v38 = vld [vmem:[#allocation5 + $0x130] ss:$24 sps:$4 sm:$0xff]  }
  0x4d   : > { %3281 = vmatpush1.bf16.msra.mxu1 %v3611_v6  ;;  %617 = vmatpush1.bf16.msra.mxu0 %v3611_v6  ;;  %v279_v33 = vld [vmem:[%s4030_s30 + $0x18] sm:$0xff]  ;;  %v3656_v39 = vld [vmem:[#allocation5 + $0x134] ss:$24 sps:$4 sm:$0xff]   ;;  %v296_v40 = vld [vmem:[%s4030_s30 + $0xa0] sm:$0xff]  ;;  %s3729_s9 = scalar_lea.vmem %s4265_s8, 4096  ;;  %s3878_s18 = smov [#allocation7]  }
  0x4e   : > { %3274 = vmatprep.subr.bf16.mxu1 %v3612_v7  ;;  %618 = vmatprep.subr.bf16.mxu0 %v3612_v7  ;;  %v3633_v35 = vld [vmem:[#allocation5 + $0xf8] ss:$24 sps:$4 sm:$0xff]   ;;  %v4060_v37 = vpack.c.bf16 %v279_v33, %v278_v32  ;;  %v297_v41 = vld [vmem:[%s4030_s30 + $0xa8] sm:$0xff]  ;;  %v3641_v43 = vld [vmem:[#allocation5 + $0x9c] ss:$24 sps:$4 sm:$0xff]   ;;  %p3730_p4 = scmp.ne.s32.totalorder %s4265_s8, %s3729_s9  ;;  %s3733_s27 = sshll.u32 %s3878_s18, 4  ;;  %s3734_s27 = int_to_ptr.vmem [resolvable:$false] %s3733_s27 }
  0x4f   : > { %v3636_v42 = vld [vmem:[#allocation5 + $0xc8] ss:$24 sps:$4 sm:$0xff]   ;;  %v4070_v46 = vpack.c.bf16 %v297_v41, %v296_v40  ;;  %v3639_v47 = vld [vmem:[#allocation5 + $0x98] ss:$24 sps:$4 sm:$0xff]   ;;  %v3644_v48 = vld [vmem:[#allocation5 + $0x6c] ss:$24 sps:$4 sm:$0xff]   ;;  %p3736_p3 = scmp.lt.s32.totalorder %s4265_s8, %s3734_s27 }
  0x50   : > { %v280_v44 = vld [vmem:[%s4030_s30 + $0x20] sm:$0xff]  ;;  %v281_v45 = vld [vmem:[%s4030_s30 + $0x28] sm:$0xff]  ;;  %v298_v52 = vld [vmem:[%s4030_s30 + $0xb0] sm:$0xff]  ;;  %p3731_p10 = pnand %p3730_p4, %p3995_p0  ;;  %s3735_s10 = scalar_lea.vmem %s3734_s27, 8192 }
  0x51   : > { %3282 = vmatpush1.bf16.msra.mxu1 %v3614_v8  ;;  %619 = vmatpush1.bf16.msra.mxu0 %v3614_v8  ;;  %v4072_v49 = vpack.c.bf16 %v281_v45, %v280_v44  ;;  %v3657_v50 = vld [vmem:[#allocation5 + $0x100] ss:$24 sps:$4 sm:$0xff]   ;;  %v3659_v51 = vld [vmem:[#allocation5 + $0x104] ss:$24 sps:$4 sm:$0xff]   ;;  %v282_v56 = vld [vmem:[%s4030_s30 + $0x30] sm:$0xff]  ;;  %p3737_p5 = scmp.lt.s32.totalorder %s3735_s10, %s3729_s9 }
  0x52   : > { %3275 = vmatprep.subr.bf16.mxu1 %v3615_v9  ;;  %620 = vmatprep.subr.bf16.mxu0 %v3615_v9  ;;  %v299_v53 = vld [vmem:[%s4030_s30 + $0xb8] sm:$0xff]  ;;  %v3642_v54 = vld [vmem:[#allocation5 + $0x68] ss:$24 sps:$4 sm:$0xff]   ;;  %v3650_v60 = vld [vmem:[#allocation5 + $0xc] ss:$24 sps:$4 sm:$0xff]   ;;  %p3732_p12 = pneg %p3731_p10 }
  0x53   : > { %v3647_v55 = vld [vmem:[#allocation5 + $0x3c] ss:$24 sps:$4 sm:$0xff]   ;;  %v4082_v58 = vpack.c.bf16 %v299_v53, %v298_v52  ;;  %v3645_v59 = vld [vmem:[#allocation5 + $0x38] ss:$24 sps:$4 sm:$0xff]   ;;  %v300_v1 = vld [vmem:[%s4030_s30 + $0xc0] sm:$0xff]  ;;  %p3738_p7 = por %p3737_p5, %p3736_p3 }
  0x54   : > { %v283_v57 = vld [vmem:[%s4030_s30 + $0x38] sm:$0xff]  ;;  %v3660_v62 = vld [vmem:[#allocation5 + $0xd0] ss:$24 sps:$4 sm:$0xff]   ;;  %v3662_v63 = vld [vmem:[#allocation5 + $0xd4] ss:$24 sps:$4 sm:$0xff]  }
  0x55   : > { %3283 = vmatpush1.bf16.msra.mxu1 %v3617_v10  ;;  %621 = vmatpush1.bf16.msra.mxu0 %v3617_v10  ;;  %v4084_v61 = vpack.c.bf16 %v283_v57, %v282_v56  ;;  %v301_v2 = vld [vmem:[%s4030_s30 + $0xc8] sm:$0xff]  ;;  %v284_v4 = vld [vmem:[%s4030_s30 + $0x40] sm:$0xff]  ;;  %v302_v10 = vld [vmem:[%s4030_s30 + $0xd0] sm:$0xff]  ;;  %p3739_p2 = pnand %p3738_p7, %p3732_p12 }
  0x56   : > { %3276 = vmatprep.subr.bf16.mxu1 %v3618_v11  ;;  %622 = vmatprep.subr.bf16.mxu0 %v3618_v11  ;;  %v3648_v3 = vld [vmem:[#allocation5 + $0x8] ss:$24 sps:$4 sm:$0xff]   ;;  %v4094_v6 = vpack.c.bf16 %v301_v2, %v300_v1  ;;  %v3665_v9 = vld [vmem:[#allocation5 + $0xa4] ss:$24 sps:$4 sm:$0xff]   ;;  %v3668_v17 = vld [vmem:[#allocation5 + $0x74] ss:$24 sps:$4 sm:$0xff]  }
  0x57   : > { %v285_v5 = vld [vmem:[%s4030_s30 + $0x48] sm:$0xff]  ;;  %v3663_v8 = vld [vmem:[#allocation5 + $0xa0] ss:$24 sps:$4 sm:$0xff]   ;;  %v3671_v27 = vld [vmem:[#allocation5 + $0x44] ss:$24 sps:$4 sm:$0xff]  }
  0x58   : > { %v4096_v7 = vpack.c.bf16 %v285_v5, %v284_v4  ;;  %v303_v11 = vld [vmem:[%s4030_s30 + $0xd8] sm:$0xff]  ;;  %v304_v18 = vld [vmem:[%s4030_s30 + $0xe0] sm:$0xff]  ;;  %v289_v21 = vld [vmem:[%s4030_s30 + $0x68] sm:$0xff] }
  0x59   : > { %3284 = vmatpush1.bf16.msra.mxu1 %v3620_v12  ;;  %623 = vmatpush1.bf16.msra.mxu0 %v3620_v12  ;;  %v286_v12 = vld [vmem:[%s4030_s30 + $0x50] sm:$0xff]  ;;  %v288_v20 = vld [vmem:[%s4030_s30 + $0x60] sm:$0xff] }
  0x5a   : > { %3277 = vmatprep.subr.bf16.mxu1 %v3621_v13  ;;  %624 = vmatprep.subr.bf16.mxu0 %v3621_v13  ;;  %v287_v13 = vld [vmem:[%s4030_s30 + $0x58] sm:$0xff] }
  0x5b   : > { %v3669_v26 = vld [vmem:[#allocation5 + $0x40] ss:$24 sps:$4 sm:$0xff]  }
  0x5d   : > { %3285 = vmatpush1.bf16.msra.mxu1 %v3623_v14  ;;  %625 = vmatpush1.bf16.msra.mxu0 %v3623_v14  ;;  %v4106_v14 = vpack.c.bf16 %v303_v11, %v302_v10 }
  0x5e   : > { %3278 = vmatprep.subr.bf16.mxu1 %v3624_v15  ;;  %626 = vmatprep.subr.bf16.mxu0 %v3624_v15  ;;  %v313_v15 = vpack.c.bf16 %v287_v13, %v286_v12 }
  0x61   : > { %3286 = vmatpush1.bf16.msra.mxu1 %v3626_v16  ;;  %627 = vmatpush1.bf16.msra.mxu0 %v3626_v16  ;;  %v3666_v16 = vld [vmem:[#allocation5 + $0x70] ss:$24 sps:$4 sm:$0xff]  }
  0x62   : > { %805 = vmatprep.subr.bf16.mxu1 %v3629_v19  ;;  %998 = vmatprep.subr.bf16.mxu0 %v3653_v31  ;;  %v305_v19 = vld [vmem:[%s4030_s30 + $0xe8] sm:$0xff]  ;;  %v291_v31 = vld [vmem:[%s4030_s30 + $0x78] sm:$0xff] }
  0x64   : > { %725 = vmatmul.mubr.bf16.vlgmr.msra.gmra.mxu1 %v4046_v22  ;;  %645 = vmatmul.mubr.bf16.vlgmr.msra.gmra.mxu0 %v4048_v25 }
  0x65   : > { %806 = vmatpush1.bf16.msra.mxu1 %v3627_v23  ;;  %734 = vmatprep.mubr.bf16.mxu1 %v3877_v0  ;;  %v4115_v23 = vpack.c.bf16 %v305_v19, %v304_v18 }
  0x66   : > { %807 = vmatprep.subr.bf16.mxu1 %v3632_v24  ;;  %999 = vmatpush1.bf16.msra.mxu0 %v3651_v30  ;;  %v314_v24 = vpack.c.bf16 %v289_v21, %v288_v20  ;;  %v290_v30 = vld [vmem:[%s4030_s30 + $0x70] sm:$0xff] }
  0x67   : > { %654 = vmatprep.mubr.bf16.mxu0 %v3877_v0  ;;  %1000 = vmatprep.subr.bf16.mxu0 %v3656_v39  ;;  %v315_v33 = vpack.c.bf16 %v291_v31, %v290_v30 }
  0x69   : > { %808 = vmatpush1.bf16.msra.mxu1 %v3630_v28  ;;  %v306_v28 = vld [vmem:[%s4030_s30 + $0xf0] sm:$0xff] }
  0x6a   : > { %809 = vmatprep.subr.bf16.mxu1 %v3635_v29  ;;  %1001 = vmatpush1.bf16.msra.mxu0 %v3654_v38  ;;  %v307_v29 = vld [vmem:[%s4030_s30 + $0xf8] sm:$0xff] }
  0x6b   : > { %1002 = vmatprep.subr.bf16.mxu0 %v3659_v51  ;;  %v4124_v32 = vpack.c.bf16 %v307_v29, %v306_v28 }
  0x6c   : > { %735 = vmatmul.mubr.bf16.gmra.mxu1 %v4058_v34  ;;  %655 = vmatmul.mubr.bf16.gmra.mxu0 %v4060_v37 }
  0x6d   : > { %744 = vmatprep.mubr.bf16.mxu1 %v3877_v0  ;;  %810 = vmatpush1.bf16.msra.mxu1 %v3633_v35  ;;  %v3674_v35 = vld [vmem:[#allocation5 + $0x14] ss:$24 sps:$4 sm:$0xff]  }
  0x6e   : > { %811 = vmatprep.subr.bf16.mxu1 %v3638_v36  ;;  %664 = vmatprep.mubr.bf16.mxu0 %v3877_v0  ;;  %v3672_v36 = vld [vmem:[#allocation5 + $0x10] ss:$24 sps:$4 sm:$0xff]  }
  0x6f   : > { %1003 = vmatpush1.bf16.msra.mxu0 %v3657_v50 }
  0x70   : > { %1004 = vmatprep.subr.bf16.mxu0 %v3662_v63 }
  0x71   : > { %812 = vmatpush1.bf16.msra.mxu1 %v3636_v42 }
  0x72   : > { %813 = vmatprep.subr.bf16.mxu1 %v3641_v43 }
  0x73   : > { %1005 = vmatpush1.bf16.msra.mxu0 %v3660_v62 }
  0x74   : > { %745 = vmatmul.mubr.bf16.gmra.mxu1 %v4070_v46  ;;  %665 = vmatmul.mubr.bf16.gmra.mxu0 %v4072_v49 }
  0x75   : > { %754 = vmatprep.mubr.bf16.mxu1 %v3877_v0  ;;  %814 = vmatpush1.bf16.msra.mxu1 %v3639_v47 }
  0x76   : > { %815 = vmatprep.subr.bf16.mxu1 %v3644_v48  ;;  %674 = vmatprep.mubr.bf16.mxu0 %v3877_v0 }
  0x77   : > { %1006 = vmatprep.subr.bf16.mxu0 %v3665_v9 }
  0x78   : > { %1007 = vmatpush1.bf16.msra.mxu0 %v3663_v8 }
  0x79   : > { %816 = vmatpush1.bf16.msra.mxu1 %v3642_v54  ;;  %1008 = vmatprep.subr.bf16.mxu0 %v3668_v17 }
  0x7a   : > { %817 = vmatprep.subr.bf16.mxu1 %v3647_v55 }
  0x7c   : > { %755 = vmatmul.mubr.bf16.gmra.mxu1 %v4082_v58  ;;  %675 = vmatmul.mubr.bf16.gmra.mxu0 %v4084_v61 }
  0x7d   : > { %764 = vmatprep.mubr.bf16.mxu1 %v3877_v0  ;;  %818 = vmatpush1.bf16.msra.mxu1 %v3645_v59 }
  0x7e   : > { %819 = vmatprep.subr.bf16.mxu1 %v3650_v60  ;;  %684 = vmatprep.mubr.bf16.mxu0 %v3877_v0 }
  0x7f   : > { %1009 = vmatpush1.bf16.msra.mxu0 %v3666_v16 }
  0x80   : > { %1010 = vmatprep.subr.bf16.mxu0 %v3671_v27 }
  0x81   : > { %820 = vmatpush1.bf16.msra.mxu1 %v3648_v3 }
  0x83   : > { %1011 = vmatpush1.bf16.msra.mxu0 %v3669_v26 }
  0x84   : > { %765 = vmatmul.mubr.bf16.gmra.mxu1 %v4094_v6  ;;  %685 = vmatmul.mubr.bf16.gmra.mxu0 %v4096_v7 }
  0x85   : > { %774 = vmatprep.mubr.bf16.mxu1 %v3877_v0  ;;  %694 = vmatprep.mubr.bf16.mxu0 %v3877_v0 }
  0x86   : > { %1012 = vmatprep.subr.bf16.mxu0 %v3674_v35 }
  0x87   : > { %1013 = vmatpush1.bf16.msra.mxu0 %v3672_v36 }
  0x8c   : > { %775 = vmatmul.mubr.bf16.gmra.mxu1 %v4106_v14  ;;  %695 = vmatmul.mubr.bf16.gmra.mxu0 %v313_v15 }
  0x8d   : > { %784 = vmatprep.mubr.bf16.mxu1 %v3877_v0  ;;  %704 = vmatprep.mubr.bf16.mxu0 %v3877_v0 }
  0x94   : > { %785 = vmatmul.mubr.bf16.gmra.mxu1 %v4115_v23  ;;  %705 = vmatmul.mubr.bf16.gmra.mxu0 %v314_v24 }
  0x95   : > { %794 = vmatprep.mubr.bf16.mxu1 %v3877_v0  ;;  %714 = vmatprep.mubr.bf16.mxu0 %v3877_v0 }
  0x9c   : > { %795 = vmatmul.mubr.bf16.gmra.mxu1 %v4124_v32  ;;  %715 = vmatmul.mubr.bf16.gmra.mxu0 %v315_v33 }
  0x9d   : > { %837 = vmatprep.mubr.bf16.mxu1 %v3877_v0  ;;  %1030 = vmatprep.mubr.bf16.mxu0 %v3877_v0 }
  0xa4   : > { %838 = vmatmul.mubr.bf16.vlgmr.msra.gmra.mxu1 %v4048_v25  ;;  %1031 = vmatmul.mubr.bf16.vlgmr.msra.gmra.mxu0 %v4048_v25 }
  0xa5   : > { %847 = vmatprep.mubr.bf16.mxu1 %v3877_v0  ;;  %1040 = vmatprep.mubr.bf16.mxu0 %v3877_v0 }
  0xac   : > { %848 = vmatmul.mubr.bf16.gmra.mxu1 %v4060_v37  ;;  %1041 = vmatmul.mubr.bf16.gmra.mxu0 %v4060_v37 }
  0xad   : > { %857 = vmatprep.mubr.bf16.mxu1 %v3877_v0  ;;  %1050 = vmatprep.mubr.bf16.mxu0 %v3877_v0 }
  0xb4   : > { %858 = vmatmul.mubr.bf16.gmra.mxu1 %v4072_v49  ;;  %1051 = vmatmul.mubr.bf16.gmra.mxu0 %v4072_v49 }
  0xb5   : > { %867 = vmatprep.mubr.bf16.mxu1 %v3877_v0  ;;  %1060 = vmatprep.mubr.bf16.mxu0 %v3877_v0 }
  0xbc   : > { %868 = vmatmul.mubr.bf16.gmra.mxu1 %v4084_v61  ;;  %1061 = vmatmul.mubr.bf16.gmra.mxu0 %v4084_v61 }
  0xbd   : > { %877 = vmatprep.mubr.bf16.mxu1 %v3877_v0  ;;  %1070 = vmatprep.mubr.bf16.mxu0 %v3877_v0 }
  0xc4   : > { %878 = vmatmul.mubr.bf16.gmra.mxu1 %v4096_v7  ;;  %1071 = vmatmul.mubr.bf16.gmra.mxu0 %v4096_v7 }
  0xc5   : > { %887 = vmatprep.mubr.bf16.mxu1 %v3877_v0  ;;  %1080 = vmatprep.mubr.bf16.mxu0 %v3877_v0 }
  0xcc   : > { %888 = vmatmul.mubr.bf16.gmra.mxu1 %v313_v15  ;;  %1081 = vmatmul.mubr.bf16.gmra.mxu0 %v313_v15 }
  0xcd   : > { %897 = vmatprep.mubr.bf16.mxu1 %v3877_v0  ;;  %1090 = vmatprep.mubr.bf16.mxu0 %v3877_v0 }
  0xd4   : > { %898 = vmatmul.mubr.bf16.gmra.mxu1 %v314_v24  ;;  %1091 = vmatmul.mubr.bf16.gmra.mxu0 %v314_v24 }
  0xd5   : > { %907 = vmatprep.mubr.bf16.mxu1 %v3877_v0  ;;  %1100 = vmatprep.mubr.bf16.mxu0 %v3877_v0 }
  0xdc   : > { %908 = vmatmul.mubr.bf16.gmra.mxu1 %v315_v33  ;;  %1101 = vmatmul.mubr.bf16.gmra.mxu0 %v315_v33 }
  0xdd   : > { %917 = vmatprep.mubr.bf16.mxu1 %v3877_v0  ;;  %1110 = vmatprep.mubr.bf16.mxu0 %v3877_v0 }
  0xe4   : > { %918 = vmatmul.mubr.bf16.gmra.mxu1 %v4046_v22  ;;  %1111 = vmatmul.mubr.bf16.gmra.mxu0 %v4046_v22 }
  0xe5   : > { %927 = vmatprep.mubr.bf16.mxu1 %v3877_v0  ;;  %1120 = vmatprep.mubr.bf16.mxu0 %v3877_v0 }
  0xec   : > { %928 = vmatmul.mubr.bf16.gmra.mxu1 %v4058_v34  ;;  %1121 = vmatmul.mubr.bf16.gmra.mxu0 %v4058_v34 }
  0xed   : > { %937 = vmatprep.mubr.bf16.mxu1 %v3877_v0  ;;  %1130 = vmatprep.mubr.bf16.mxu0 %v3877_v0 }
  0xf4   : > { %938 = vmatmul.mubr.bf16.gmra.mxu1 %v4070_v46  ;;  %1131 = vmatmul.mubr.bf16.gmra.mxu0 %v4070_v46 }
  0xf5   : > { %947 = vmatprep.mubr.bf16.mxu1 %v3877_v0  ;;  %1140 = vmatprep.mubr.bf16.mxu0 %v3877_v0 }
  0xfc   : > { %948 = vmatmul.mubr.bf16.gmra.mxu1 %v4082_v58  ;;  %1141 = vmatmul.mubr.bf16.gmra.mxu0 %v4082_v58 }
  0xfd   : > { %957 = vmatprep.mubr.bf16.mxu1 %v3877_v0  ;;  %1150 = vmatprep.mubr.bf16.mxu0 %v3877_v0 }
 0x104   : > { %958 = vmatmul.mubr.bf16.gmra.mxu1 %v4094_v6  ;;  %1151 = vmatmul.mubr.bf16.gmra.mxu0 %v4094_v6 }
 0x105   : > { %967 = vmatprep.mubr.bf16.mxu1 %v3877_v0  ;;  %1160 = vmatprep.mubr.bf16.mxu0 %v3877_v0 }
 0x10c   : > { %968 = vmatmul.mubr.bf16.gmra.mxu1 %v4106_v14  ;;  %1161 = vmatmul.mubr.bf16.gmra.mxu0 %v4106_v14 }
 0x10d   : > { %977 = vmatprep.mubr.bf16.mxu1 %v3877_v0  ;;  %1170 = vmatprep.mubr.bf16.mxu0 %v3877_v0 }
 0x114   : > { %978 = vmatmul.mubr.bf16.gmra.mxu1 %v4115_v23  ;;  %1171 = vmatmul.mubr.bf16.gmra.mxu0 %v4115_v23 }
 0x115   : > { %987 = vmatprep.mubr.bf16.mxu1 %v3877_v0  ;;  %1180 = vmatprep.mubr.bf16.mxu0 %v3877_v0 }
 0x11c   : > { %988 = vmatmul.mubr.bf16.gmra.mxu1 %v4124_v32  ;;  %1181 = vmatmul.mubr.bf16.gmra.mxu0 %v4124_v32 }
 0x124   : > { %v726_v22 = vpop.f32.mrf.mxu1  ;;  %v646_v25 = vpop.f32.mrf.mxu0 }
 0x126   : > { %v728_v34 = vpop.f32.mrf.mxu1  ;;  %v648_v37 = vpop.f32.mrf.mxu0 }
 0x128   : > { %v730_v38 = vpop.f32.mrf.mxu1  ;;  %v650_v39 = vpop.f32.mrf.mxu0 }
 0x129   : > { %v2932_v40 = vpack.c.bf16 %v730_v38, %v726_v22  ;;  %v2892_v41 = vpack.c.bf16 %v650_v39, %v646_v25 }
 0x12a   : > { %v732_v42 = vpop.f32.mrf.mxu1  ;;  %v652_v43 = vpop.f32.mrf.mxu0 }
 0x12b   : > { %3216 = vst [vmem:[%s4186_s22 + $0x40] sm:$0xff] %v2932_v40   ;;  %v3012_v0 = vpack.c.bf16 %v732_v42, %v728_v34  ;;  %2893 = vst [vmem:[%s4186_s22] sm:$0xff] %v2892_v41   ;;  %v2972_v44 = vpack.c.bf16 %v652_v43, %v648_v37 }
 0x12c   : > { %v736_v45 = vpop.f32.mrf.mxu1  ;;  %v656_v46 = vpop.f32.mrf.mxu0 }
 0x12d   : > { %3232 = vst [vmem:[%s4186_s22 + $0xc0] sm:$0xff] %v3012_v0   ;;  %3224 = vst [vmem:[%s4186_s22 + $0x80] sm:$0xff] %v2972_v44  }
 0x12e   : > { %v738_v47 = vpop.f32.mrf.mxu1  ;;  %v658_v48 = vpop.f32.mrf.mxu0 }
 0x130   : > { %v740_v49 = vpop.f32.mrf.mxu1  ;;  %v660_v50 = vpop.f32.mrf.mxu0 }
 0x131   : > { %v2937_v51 = vpack.c.bf16 %v740_v49, %v736_v45  ;;  %v2897_v52 = vpack.c.bf16 %v660_v50, %v656_v46 }
 0x132   : > { %v742_v53 = vpop.f32.mrf.mxu1  ;;  %v662_v54 = vpop.f32.mrf.mxu0 }
 0x133   : > { %3217 = vst [vmem:[%s4186_s22 + $0x48] sm:$0xff] %v2937_v51   ;;  %v3017_v55 = vpack.c.bf16 %v742_v53, %v738_v47  ;;  %3209 = vst [vmem:[%s4186_s22 + $0x8] sm:$0xff] %v2897_v52   ;;  %v2977_v56 = vpack.c.bf16 %v662_v54, %v658_v48 }
 0x134   : > { %v746_v57 = vpop.f32.mrf.mxu1  ;;  %v666_v58 = vpop.f32.mrf.mxu0 }
 0x135   : > { %3233 = vst [vmem:[%s4186_s22 + $0xc8] sm:$0xff] %v3017_v55   ;;  %3225 = vst [vmem:[%s4186_s22 + $0x88] sm:$0xff] %v2977_v56  }
 0x136   : > { %v748_v59 = vpop.f32.mrf.mxu1  ;;  %v668_v60 = vpop.f32.mrf.mxu0 }
 0x138   : > { %v750_v61 = vpop.f32.mrf.mxu1  ;;  %v670_v62 = vpop.f32.mrf.mxu0 }
 0x139   : > { %v2942_v63 = vpack.c.bf16 %v750_v61, %v746_v57  ;;  %v2902_v1 = vpack.c.bf16 %v670_v62, %v666_v58 }
 0x13a   : > { %v752_v2 = vpop.f32.mrf.mxu1  ;;  %v672_v3 = vpop.f32.mrf.mxu0 }
 0x13b   : > { %3218 = vst [vmem:[%s4186_s22 + $0x50] sm:$0xff] %v2942_v63   ;;  %v3022_v4 = vpack.c.bf16 %v752_v2, %v748_v59  ;;  %3210 = vst [vmem:[%s4186_s22 + $0x10] sm:$0xff] %v2902_v1   ;;  %v2982_v5 = vpack.c.bf16 %v672_v3, %v668_v60 }
 0x13c   : > { %v756_v6 = vpop.f32.mrf.mxu1  ;;  %v676_v7 = vpop.f32.mrf.mxu0 }
 0x13d   : > { %3234 = vst [vmem:[%s4186_s22 + $0xd0] sm:$0xff] %v3022_v4   ;;  %3226 = vst [vmem:[%s4186_s22 + $0x90] sm:$0xff] %v2982_v5  }
 0x13e   : > { %v758_v8 = vpop.f32.mrf.mxu1  ;;  %v678_v9 = vpop.f32.mrf.mxu0 }
 0x140   : > { %v760_v10 = vpop.f32.mrf.mxu1  ;;  %v680_v11 = vpop.f32.mrf.mxu0 }
 0x141   : > { %v2947_v12 = vpack.c.bf16 %v760_v10, %v756_v6  ;;  %v2907_v13 = vpack.c.bf16 %v680_v11, %v676_v7 }
 0x142   : > { %v762_v14 = vpop.f32.mrf.mxu1  ;;  %v682_v15 = vpop.f32.mrf.mxu0 }
 0x143   : > { %3219 = vst [vmem:[%s4186_s22 + $0x58] sm:$0xff] %v2947_v12   ;;  %v3027_v16 = vpack.c.bf16 %v762_v14, %v758_v8  ;;  %3211 = vst [vmem:[%s4186_s22 + $0x18] sm:$0xff] %v2907_v13   ;;  %v2987_v17 = vpack.c.bf16 %v682_v15, %v678_v9 }
 0x144   : > { %v766_v18 = vpop.f32.mrf.mxu1  ;;  %v686_v19 = vpop.f32.mrf.mxu0 }
 0x145   : > { %3235 = vst [vmem:[%s4186_s22 + $0xd8] sm:$0xff] %v3027_v16   ;;  %3227 = vst [vmem:[%s4186_s22 + $0x98] sm:$0xff] %v2987_v17  }
 0x146   : > { %v768_v20 = vpop.f32.mrf.mxu1  ;;  %v688_v21 = vpop.f32.mrf.mxu0 }
 0x148   : > { %v770_v23 = vpop.f32.mrf.mxu1  ;;  %v690_v24 = vpop.f32.mrf.mxu0 }
 0x149   : > { %v2952_v26 = vpack.c.bf16 %v770_v23, %v766_v18  ;;  %v2912_v27 = vpack.c.bf16 %v690_v24, %v686_v19 }
 0x14a   : > { %v772_v28 = vpop.f32.mrf.mxu1  ;;  %v692_v29 = vpop.f32.mrf.mxu0 }
 0x14b   : > { %3220 = vst [vmem:[%s4186_s22 + $0x60] sm:$0xff] %v2952_v26   ;;  %v3032_v30 = vpack.c.bf16 %v772_v28, %v768_v20  ;;  %3212 = vst [vmem:[%s4186_s22 + $0x20] sm:$0xff] %v2912_v27   ;;  %v2992_v31 = vpack.c.bf16 %v692_v29, %v688_v21 }
 0x14c   : > { %v776_v32 = vpop.f32.mrf.mxu1  ;;  %v696_v33 = vpop.f32.mrf.mxu0 }
 0x14d   : > { %3236 = vst [vmem:[%s4186_s22 + $0xe0] sm:$0xff] %v3032_v30   ;;  %3228 = vst [vmem:[%s4186_s22 + $0xa0] sm:$0xff] %v2992_v31  }
 0x14e   : > { %v778_v35 = vpop.f32.mrf.mxu1  ;;  %v698_v36 = vpop.f32.mrf.mxu0 }
 0x150   : > { %v780_v22 = vpop.f32.mrf.mxu1  ;;  %v700_v25 = vpop.f32.mrf.mxu0 }
 0x151   : > { %v2957_v34 = vpack.c.bf16 %v780_v22, %v776_v32  ;;  %v2917_v37 = vpack.c.bf16 %v700_v25, %v696_v33 }
 0x152   : > { %v782_v38 = vpop.f32.mrf.mxu1  ;;  %v702_v39 = vpop.f32.mrf.mxu0 }
 0x153   : > { %3221 = vst [vmem:[%s4186_s22 + $0x68] sm:$0xff] %v2957_v34   ;;  %v3037_v40 = vpack.c.bf16 %v782_v38, %v778_v35  ;;  %3213 = vst [vmem:[%s4186_s22 + $0x28] sm:$0xff] %v2917_v37   ;;  %v2997_v41 = vpack.c.bf16 %v702_v39, %v698_v36 }
 0x154   : > { %v786_v42 = vpop.f32.mrf.mxu1  ;;  %v706_v43 = vpop.f32.mrf.mxu0 }
 0x155   : > { %3237 = vst [vmem:[%s4186_s22 + $0xe8] sm:$0xff] %v3037_v40   ;;  %3229 = vst [vmem:[%s4186_s22 + $0xa8] sm:$0xff] %v2997_v41  }
 0x156   : > { %v788_v0 = vpop.f32.mrf.mxu1  ;;  %v708_v44 = vpop.f32.mrf.mxu0 }
 0x158   : > { %v790_v45 = vpop.f32.mrf.mxu1  ;;  %v710_v46 = vpop.f32.mrf.mxu0 }
 0x159   : > { %v2962_v47 = vpack.c.bf16 %v790_v45, %v786_v42  ;;  %v2922_v48 = vpack.c.bf16 %v710_v46, %v706_v43 }
 0x15a   : > { %v792_v49 = vpop.f32.mrf.mxu1  ;;  %v712_v50 = vpop.f32.mrf.mxu0 }
 0x15b   : > { %3222 = vst [vmem:[%s4186_s22 + $0x70] sm:$0xff] %v2962_v47   ;;  %v3042_v51 = vpack.c.bf16 %v792_v49, %v788_v0  ;;  %3214 = vst [vmem:[%s4186_s22 + $0x30] sm:$0xff] %v2922_v48   ;;  %v3002_v52 = vpack.c.bf16 %v712_v50, %v708_v44 }
 0x15c   : > { %v796_v53 = vpop.f32.mrf.mxu1  ;;  %v716_v54 = vpop.f32.mrf.mxu0 }
 0x15d   : > { %3238 = vst [vmem:[%s4186_s22 + $0xf0] sm:$0xff] %v3042_v51   ;;  %3230 = vst [vmem:[%s4186_s22 + $0xb0] sm:$0xff] %v3002_v52  }
 0x15e   : > { %v798_v55 = vpop.f32.mrf.mxu1  ;;  %v718_v56 = vpop.f32.mrf.mxu0 }
 0x160   : > { %v800_v57 = vpop.f32.mrf.mxu1  ;;  %v720_v58 = vpop.f32.mrf.mxu0 }
 0x161   : > { %v2967_v59 = vpack.c.bf16 %v800_v57, %v796_v53  ;;  %v2927_v60 = vpack.c.bf16 %v720_v58, %v716_v54 }
 0x162   : > { %v802_v61 = vpop.f32.mrf.mxu1  ;;  %v722_v62 = vpop.f32.mrf.mxu0 }
 0x163   : > { %3223 = vst [vmem:[%s4186_s22 + $0x78] sm:$0xff] %v2967_v59   ;;  %v3047_v63 = vpack.c.bf16 %v802_v61, %v798_v55  ;;  %3215 = vst [vmem:[%s4186_s22 + $0x38] sm:$0xff] %v2927_v60   ;;  %v3007_v1 = vpack.c.bf16 %v722_v62, %v718_v56 }
 0x164   : > { %v839_v2 = vpop.f32.mrf.mxu1  ;;  %v1032_v3 = vpop.f32.mrf.mxu0 }
 0x165   : > { %3239 = vst [vmem:[%s4186_s22 + $0xf8] sm:$0xff] %v3047_v63   ;;  %3231 = vst [vmem:[%s4186_s22 + $0xb8] sm:$0xff] %v3007_v1  }
 0x166   : > { %v841_v4 = vpop.f32.mrf.mxu1  ;;  %v1034_v5 = vpop.f32.mrf.mxu0 }
 0x167   : > { %v3379_v6 = vpack.i.bf16 %v841_v4, %v839_v2 }
 0x168   : > { %v843_v7 = vpop.f32.mrf.mxu1  ;;  %v1036_v8 = vpop.f32.mrf.mxu0 }
 0x169   : > { %3380 = vxpose.xlu0.b32.start [1/16] %v3379_v6, 128  ;;  %v3052_v9 = vpack.c.bf16 %v1036_v8, %v1032_v3 }
 0x16a   : > { %v845_v10 = vpop.f32.mrf.mxu1  ;;  %v1038_v11 = vpop.f32.mrf.mxu0 }
 0x16b   : > { %v3381_v12 = vpack.i.bf16 %v845_v10, %v843_v7  ;;  %3053 = vst [vmem:[%s4221_s23] sm:$0xff] %v3052_v9   ;;  %v3132_v13 = vpack.c.bf16 %v1038_v11, %v1034_v5 }
 0x16c   : > { %v849_v14 = vpop.f32.mrf.mxu1  ;;  %v1042_v15 = vpop.f32.mrf.mxu0 }
 0x16d   : > { %3382 = vxpose.xlu0.b32.cont [2/16] %v3381_v12, 128  ;;  %3255 = vst [vmem:[%s4221_s23 + $0x80] sm:$0xff] %v3132_v13  }
 0x16e   : > { %v851_v16 = vpop.f32.mrf.mxu1  ;;  %v1044_v17 = vpop.f32.mrf.mxu0 }
 0x16f   : > { %v3383_v18 = vpack.i.bf16 %v851_v16, %v849_v14 }
 0x170   : > { %v853_v19 = vpop.f32.mrf.mxu1  ;;  %v1046_v20 = vpop.f32.mrf.mxu0 }
 0x171   : > { %3384 = vxpose.xlu0.b32.cont [3/16] %v3383_v18, 128  ;;  %v3057_v21 = vpack.c.bf16 %v1046_v20, %v1042_v15 }
 0x172   : > { %v855_v23 = vpop.f32.mrf.mxu1  ;;  %v1048_v24 = vpop.f32.mrf.mxu0 }
 0x173   : > { %v3385_v26 = vpack.i.bf16 %v855_v23, %v853_v19  ;;  %3240 = vst [vmem:[%s4221_s23 + $0x8] sm:$0xff] %v3057_v21   ;;  %v3137_v27 = vpack.c.bf16 %v1048_v24, %v1044_v17 }
 0x174   : > { %v859_v28 = vpop.f32.mrf.mxu1  ;;  %v1052_v29 = vpop.f32.mrf.mxu0 }
 0x175   : > { %3386 = vxpose.xlu0.b32.cont [4/16] %v3385_v26, 128  ;;  %3256 = vst [vmem:[%s4221_s23 + $0x88] sm:$0xff] %v3137_v27  }
 0x176   : > { %v861_v30 = vpop.f32.mrf.mxu1  ;;  %v1054_v31 = vpop.f32.mrf.mxu0 }
 0x177   : > { %v3387_v32 = vpack.i.bf16 %v861_v30, %v859_v28 }
 0x178   : > { %v863_v33 = vpop.f32.mrf.mxu1  ;;  %v1056_v35 = vpop.f32.mrf.mxu0 }
 0x179   : > { %3388 = vxpose.xlu0.b32.cont [5/16] %v3387_v32, 128  ;;  %v3062_v36 = vpack.c.bf16 %v1056_v35, %v1052_v29 }
 0x17a   : > { %v865_v22 = vpop.f32.mrf.mxu1  ;;  %v1058_v25 = vpop.f32.mrf.mxu0 }
 0x17b   : > { %v3389_v34 = vpack.i.bf16 %v865_v22, %v863_v33  ;;  %3241 = vst [vmem:[%s4221_s23 + $0x10] sm:$0xff] %v3062_v36   ;;  %v3142_v37 = vpack.c.bf16 %v1058_v25, %v1054_v31 }
 0x17c   : > { %v869_v38 = vpop.f32.mrf.mxu1  ;;  %v1062_v39 = vpop.f32.mrf.mxu0 }
 0x17d   : > { %3390 = vxpose.xlu0.b32.cont [6/16] %v3389_v34, 128  ;;  %3257 = vst [vmem:[%s4221_s23 + $0x90] sm:$0xff] %v3142_v37  }
 0x17e   : > { %v871_v40 = vpop.f32.mrf.mxu1  ;;  %v1064_v41 = vpop.f32.mrf.mxu0 }
 0x17f   : > { %v3391_v42 = vpack.i.bf16 %v871_v40, %v869_v38 }
 0x180   : > { %v873_v43 = vpop.f32.mrf.mxu1  ;;  %v1066_v0 = vpop.f32.mrf.mxu0 }
 0x181   : > { %3392 = vxpose.xlu0.b32.cont [7/16] %v3391_v42, 128  ;;  %v3067_v44 = vpack.c.bf16 %v1066_v0, %v1062_v39 }
 0x182   : > { %v875_v45 = vpop.f32.mrf.mxu1  ;;  %v1068_v46 = vpop.f32.mrf.mxu0 }
 0x183   : > { %v3393_v47 = vpack.i.bf16 %v875_v45, %v873_v43  ;;  %3242 = vst [vmem:[%s4221_s23 + $0x18] sm:$0xff] %v3067_v44   ;;  %v3147_v48 = vpack.c.bf16 %v1068_v46, %v1064_v41 }
 0x184   : > { %v879_v49 = vpop.f32.mrf.mxu1  ;;  %v1072_v50 = vpop.f32.mrf.mxu0 }
 0x185   : > { %3394 = vxpose.xlu0.b32.cont [8/16] %v3393_v47, 128  ;;  %3258 = vst [vmem:[%s4221_s23 + $0x98] sm:$0xff] %v3147_v48  }
 0x186   : > { %v881_v51 = vpop.f32.mrf.mxu1  ;;  %v1074_v52 = vpop.f32.mrf.mxu0 }
 0x187   : > { %v3395_v53 = vpack.i.bf16 %v881_v51, %v879_v49 }
 0x188   : > { %v883_v54 = vpop.f32.mrf.mxu1  ;;  %v1076_v55 = vpop.f32.mrf.mxu0 }
 0x189   : > { %3396 = vxpose.xlu0.b32.cont [9/16] %v3395_v53, 128  ;;  %v3072_v56 = vpack.c.bf16 %v1076_v55, %v1072_v50 }
 0x18a   : > { %v885_v57 = vpop.f32.mrf.mxu1  ;;  %v1078_v58 = vpop.f32.mrf.mxu0 }
 0x18b   : > { %v3397_v59 = vpack.i.bf16 %v885_v57, %v883_v54  ;;  %3243 = vst [vmem:[%s4221_s23 + $0x20] sm:$0xff] %v3072_v56   ;;  %v3152_v60 = vpack.c.bf16 %v1078_v58, %v1074_v52 }
 0x18c   : > { %v889_v61 = vpop.f32.mrf.mxu1  ;;  %v1082_v62 = vpop.f32.mrf.mxu0 }
 0x18d   : > { %3398 = vxpose.xlu0.b32.cont [10/16] %v3397_v59, 128  ;;  %3259 = vst [vmem:[%s4221_s23 + $0xa0] sm:$0xff] %v3152_v60  }
 0x18e   : > { %v891_v63 = vpop.f32.mrf.mxu1  ;;  %v1084_v1 = vpop.f32.mrf.mxu0 }
 0x18f   : > { %v3399_v2 = vpack.i.bf16 %v891_v63, %v889_v61 }
 0x190   : > { %v893_v3 = vpop.f32.mrf.mxu1  ;;  %v1086_v4 = vpop.f32.mrf.mxu0 }
 0x191   : > { %3400 = vxpose.xlu0.b32.cont [11/16] %v3399_v2, 128  ;;  %v3077_v5 = vpack.c.bf16 %v1086_v4, %v1082_v62 }
 0x192   : > { %v895_v6 = vpop.f32.mrf.mxu1  ;;  %v1088_v7 = vpop.f32.mrf.mxu0 }
 0x193   : > { %v3401_v8 = vpack.i.bf16 %v895_v6, %v893_v3  ;;  %3244 = vst [vmem:[%s4221_s23 + $0x28] sm:$0xff] %v3077_v5   ;;  %v3157_v9 = vpack.c.bf16 %v1088_v7, %v1084_v1 }
 0x194   : > { %v899_v10 = vpop.f32.mrf.mxu1  ;;  %v1092_v11 = vpop.f32.mrf.mxu0 }
 0x195   : > { %3402 = vxpose.xlu0.b32.cont [12/16] %v3401_v8, 128  ;;  %3260 = vst [vmem:[%s4221_s23 + $0xa8] sm:$0xff] %v3157_v9  }
 0x196   : > { %v901_v12 = vpop.f32.mrf.mxu1  ;;  %v1094_v13 = vpop.f32.mrf.mxu0 }
 0x197   : > { %v3403_v14 = vpack.i.bf16 %v901_v12, %v899_v10 }
 0x198   : > { %v903_v15 = vpop.f32.mrf.mxu1  ;;  %v1096_v16 = vpop.f32.mrf.mxu0 }
 0x199   : > { %3404 = vxpose.xlu0.b32.cont [13/16] %v3403_v14, 128  ;;  %v3082_v17 = vpack.c.bf16 %v1096_v16, %v1092_v11 }
 0x19a   : > { %v905_v18 = vpop.f32.mrf.mxu1  ;;  %v1098_v19 = vpop.f32.mrf.mxu0 }
 0x19b   : > { %v3405_v20 = vpack.i.bf16 %v905_v18, %v903_v15  ;;  %3245 = vst [vmem:[%s4221_s23 + $0x30] sm:$0xff] %v3082_v17   ;;  %v3162_v21 = vpack.c.bf16 %v1098_v19, %v1094_v13 }
 0x19c   : > { %v909_v23 = vpop.f32.mrf.mxu1  ;;  %v1102_v24 = vpop.f32.mrf.mxu0 }
 0x19d   : > { %3406 = vxpose.xlu0.b32.cont [14/16] %v3405_v20, 128  ;;  %3261 = vst [vmem:[%s4221_s23 + $0xb0] sm:$0xff] %v3162_v21  }
 0x19e   : > { %v911_v26 = vpop.f32.mrf.mxu1  ;;  %v1104_v27 = vpop.f32.mrf.mxu0 }
 0x19f   : > { %v3407_v28 = vpack.i.bf16 %v911_v26, %v909_v23 }
 0x1a0   : > { %v913_v29 = vpop.f32.mrf.mxu1  ;;  %v1106_v30 = vpop.f32.mrf.mxu0 }
 0x1a1   : > { %3408 = vxpose.xlu0.b32.cont [15/16] %v3407_v28, 128  ;;  %v3087_v31 = vpack.c.bf16 %v1106_v30, %v1102_v24 }
 0x1a2   : > { %v915_v32 = vpop.f32.mrf.mxu1  ;;  %v1108_v33 = vpop.f32.mrf.mxu0 }
 0x1a3   : > { %v3409_v35 = vpack.i.bf16 %v915_v32, %v913_v29  ;;  %3246 = vst [vmem:[%s4221_s23 + $0x38] sm:$0xff] %v3087_v31   ;;  %v3167_v36 = vpack.c.bf16 %v1108_v33, %v1104_v27 }
 0x1a4   : > { %v919_v22 = vpop.f32.mrf.mxu1  ;;  %v1112_v25 = vpop.f32.mrf.mxu0 }
 0x1a5   : > { %3410 = vxpose.xlu0.b32.end [16/16] %v3409_v35, 128  ;;  %3262 = vst [vmem:[%s4221_s23 + $0xb8] sm:$0xff] %v3167_v36  }
 0x1a6   : > { %v921_v34 = vpop.f32.mrf.mxu1  ;;  %v1114_v37 = vpop.f32.mrf.mxu0 }
 0x1a7   : > { %v3491_v38 = vpack.i.bf16 %v921_v34, %v919_v22 }
 0x1a8   : > { %v923_v39 = vpop.f32.mrf.mxu1  ;;  %v1116_v40 = vpop.f32.mrf.mxu0 }
 0x1a9   : > { %3492 = vxpose.xlu1.b32.start [1/16] %v3491_v38, 128  ;;  %v3092_v41 = vpack.c.bf16 %v1116_v40, %v1112_v25 }
 0x1aa   : > { %v925_v42 = vpop.f32.mrf.mxu1  ;;  %v1118_v43 = vpop.f32.mrf.mxu0 }
 0x1ab   : > { %v3493_v0 = vpack.i.bf16 %v925_v42, %v923_v39  ;;  %3247 = vst [vmem:[%s4221_s23 + $0x40] sm:$0xff] %v3092_v41   ;;  %v3172_v44 = vpack.c.bf16 %v1118_v43, %v1114_v37 }
 0x1ac   : > { %v929_v45 = vpop.f32.mrf.mxu1  ;;  %v1122_v46 = vpop.f32.mrf.mxu0 }
 0x1ad   : > { %3494 = vxpose.xlu1.b32.cont [2/16] %v3493_v0, 128  ;;  %3263 = vst [vmem:[%s4221_s23 + $0xc0] sm:$0xff] %v3172_v44  }
 0x1ae   : > { %v931_v47 = vpop.f32.mrf.mxu1  ;;  %v1124_v48 = vpop.f32.mrf.mxu0 }
 0x1af   : > { %v3495_v49 = vpack.i.bf16 %v931_v47, %v929_v45 }
 0x1b0   : > { %v933_v50 = vpop.f32.mrf.mxu1  ;;  %v1126_v51 = vpop.f32.mrf.mxu0 }
 0x1b1   : > { %3496 = vxpose.xlu1.b32.cont [3/16] %v3495_v49, 128  ;;  %v3097_v52 = vpack.c.bf16 %v1126_v51, %v1122_v46 }
 0x1b2   : > { %v935_v53 = vpop.f32.mrf.mxu1  ;;  %v1128_v54 = vpop.f32.mrf.mxu0 }
 0x1b3   : > { %v3497_v55 = vpack.i.bf16 %v935_v53, %v933_v50  ;;  %3248 = vst [vmem:[%s4221_s23 + $0x48] sm:$0xff] %v3097_v52   ;;  %v3177_v56 = vpack.c.bf16 %v1128_v54, %v1124_v48 }
 0x1b4   : > { %v939_v57 = vpop.f32.mrf.mxu1  ;;  %v1132_v58 = vpop.f32.mrf.mxu0 }
 0x1b5   : > { %3498 = vxpose.xlu1.b32.cont [4/16] %v3497_v55, 128  ;;  %3264 = vst [vmem:[%s4221_s23 + $0xc8] sm:$0xff] %v3177_v56  }
 0x1b6   : > { %v941_v59 = vpop.f32.mrf.mxu1  ;;  %v1134_v60 = vpop.f32.mrf.mxu0 }
 0x1b7   : > { %v3499_v61 = vpack.i.bf16 %v941_v59, %v939_v57 }
 0x1b8   : > { %v943_v62 = vpop.f32.mrf.mxu1  ;;  %v1136_v63 = vpop.f32.mrf.mxu0 }
 0x1b9   : > { %3500 = vxpose.xlu1.b32.cont [5/16] %v3499_v61, 128  ;;  %v3102_v1 = vpack.c.bf16 %v1136_v63, %v1132_v58 }
 0x1ba   : > { %v945_v2 = vpop.f32.mrf.mxu1  ;;  %v1138_v3 = vpop.f32.mrf.mxu0 }
 0x1bb   : > { %v3501_v4 = vpack.i.bf16 %v945_v2, %v943_v62  ;;  %3249 = vst [vmem:[%s4221_s23 + $0x50] sm:$0xff] %v3102_v1   ;;  %v3182_v5 = vpack.c.bf16 %v1138_v3, %v1134_v60 }
 0x1bc   : > { %v949_v6 = vpop.f32.mrf.mxu1  ;;  %v1142_v7 = vpop.f32.mrf.mxu0 }
 0x1bd   : > { %3502 = vxpose.xlu1.b32.cont [6/16] %v3501_v4, 128  ;;  %3265 = vst [vmem:[%s4221_s23 + $0xd0] sm:$0xff] %v3182_v5  }
 0x1be   : > { %v951_v8 = vpop.f32.mrf.mxu1  ;;  %v1144_v9 = vpop.f32.mrf.mxu0 }
 0x1bf   : > { %v3503_v10 = vpack.i.bf16 %v951_v8, %v949_v6 }
 0x1c0   : > { %v953_v11 = vpop.f32.mrf.mxu1  ;;  %v1146_v12 = vpop.f32.mrf.mxu0 }
 0x1c1   : > { %3504 = vxpose.xlu1.b32.cont [7/16] %v3503_v10, 128  ;;  %v3107_v13 = vpack.c.bf16 %v1146_v12, %v1142_v7 }
 0x1c2   : > { %v955_v14 = vpop.f32.mrf.mxu1  ;;  %v1148_v15 = vpop.f32.mrf.mxu0 }
 0x1c3   : > { %v3505_v16 = vpack.i.bf16 %v955_v14, %v953_v11  ;;  %3250 = vst [vmem:[%s4221_s23 + $0x58] sm:$0xff] %v3107_v13   ;;  %v3187_v17 = vpack.c.bf16 %v1148_v15, %v1144_v9 }
 0x1c4   : > { %v959_v18 = vpop.f32.mrf.mxu1  ;;  %v1152_v19 = vpop.f32.mrf.mxu0 }
 0x1c5   : > { %3506 = vxpose.xlu1.b32.cont [8/16] %v3505_v16, 128  ;;  %3266 = vst [vmem:[%s4221_s23 + $0xd8] sm:$0xff] %v3187_v17  }
 0x1c6   : > { %v961_v20 = vpop.f32.mrf.mxu1  ;;  %v1154_v21 = vpop.f32.mrf.mxu0 }
 0x1c7   : > { %v3507_v23 = vpack.i.bf16 %v961_v20, %v959_v18 }
 0x1c8   : > { %v963_v24 = vpop.f32.mrf.mxu1  ;;  %v1156_v26 = vpop.f32.mrf.mxu0 }
 0x1c9   : > { %3508 = vxpose.xlu1.b32.cont [9/16] %v3507_v23, 128  ;;  %v3112_v27 = vpack.c.bf16 %v1156_v26, %v1152_v19 }
 0x1ca   : > { %v965_v28 = vpop.f32.mrf.mxu1  ;;  %v1158_v29 = vpop.f32.mrf.mxu0 }
 0x1cb   : > { %v3509_v30 = vpack.i.bf16 %v965_v28, %v963_v24  ;;  %3251 = vst [vmem:[%s4221_s23 + $0x60] sm:$0xff] %v3112_v27   ;;  %v3192_v31 = vpack.c.bf16 %v1158_v29, %v1154_v21 }
 0x1cc   : > { %v969_v32 = vpop.f32.mrf.mxu1  ;;  %v1162_v33 = vpop.f32.mrf.mxu0 }
 0x1cd   : > { %3510 = vxpose.xlu1.b32.cont [10/16] %v3509_v30, 128  ;;  %3267 = vst [vmem:[%s4221_s23 + $0xe0] sm:$0xff] %v3192_v31  }
 0x1ce   : > { %v971_v35 = vpop.f32.mrf.mxu1  ;;  %v1164_v36 = vpop.f32.mrf.mxu0 }
 0x1cf   : > { %v3511_v22 = vpack.i.bf16 %v971_v35, %v969_v32 }
 0x1d0   : > { %v973_v25 = vpop.f32.mrf.mxu1  ;;  %v1166_v34 = vpop.f32.mrf.mxu0 }
 0x1d1   : > { %3512 = vxpose.xlu1.b32.cont [11/16] %v3511_v22, 128  ;;  %v3117_v37 = vpack.c.bf16 %v1166_v34, %v1162_v33 }
 0x1d2   : > { %v975_v38 = vpop.f32.mrf.mxu1  ;;  %v1168_v39 = vpop.f32.mrf.mxu0 }
 0x1d3   : > { %v3513_v40 = vpack.i.bf16 %v975_v38, %v973_v25  ;;  %3252 = vst [vmem:[%s4221_s23 + $0x68] sm:$0xff] %v3117_v37   ;;  %v3197_v41 = vpack.c.bf16 %v1168_v39, %v1164_v36 }
 0x1d4   : > { %v979_v42 = vpop.f32.mrf.mxu1  ;;  %v1172_v43 = vpop.f32.mrf.mxu0 }
 0x1d5   : > { %3514 = vxpose.xlu1.b32.cont [12/16] %v3513_v40, 128  ;;  %3268 = vst [vmem:[%s4221_s23 + $0xe8] sm:$0xff] %v3197_v41  }
 0x1d6   : > { %v981_v0 = vpop.f32.mrf.mxu1  ;;  %v1174_v44 = vpop.f32.mrf.mxu0 }
 0x1d7   : > { %v3515_v45 = vpack.i.bf16 %v981_v0, %v979_v42 }
 0x1d8   : > { %v983_v46 = vpop.f32.mrf.mxu1  ;;  %v1176_v47 = vpop.f32.mrf.mxu0 }
 0x1d9   : > { %3516 = vxpose.xlu1.b32.cont [13/16] %v3515_v45, 128  ;;  %v3122_v48 = vpack.c.bf16 %v1176_v47, %v1172_v43 }
 0x1da   : > { %v985_v49 = vpop.f32.mrf.mxu1  ;;  %v1178_v50 = vpop.f32.mrf.mxu0 }
 0x1db   : > { %v3517_v51 = vpack.i.bf16 %v985_v49, %v983_v46  ;;  %3253 = vst [vmem:[%s4221_s23 + $0x70] sm:$0xff] %v3122_v48   ;;  %v3202_v52 = vpack.c.bf16 %v1178_v50, %v1174_v44 }
 0x1dc   : > { %v989_v53 = vpop.f32.mrf.mxu1  ;;  %v1182_v54 = vpop.f32.mrf.mxu0 }
 0x1dd   : > { %3518 = vxpose.xlu1.b32.cont [14/16] %v3517_v51, 128  ;;  %3269 = vst [vmem:[%s4221_s23 + $0xf0] sm:$0xff] %v3202_v52  }
 0x1de   : > { %v991_v55 = vpop.f32.mrf.mxu1  ;;  %v1184_v56 = vpop.f32.mrf.mxu0 }
 0x1df   : > { %v3519_v57 = vpack.i.bf16 %v991_v55, %v989_v53 }
 0x1e0   : > { %v993_v58 = vpop.f32.mrf.mxu1  ;;  %v1186_v59 = vpop.f32.mrf.mxu0 }
 0x1e1   : > { %3520 = vxpose.xlu1.b32.cont [15/16] %v3519_v57, 128  ;;  %v3127_v60 = vpack.c.bf16 %v1186_v59, %v1182_v54 }
 0x1e2   : > { %v995_v61 = vpop.f32.mrf.mxu1  ;;  %v1188_v62 = vpop.f32.mrf.mxu0 }
 0x1e3   : > { %v3521_v63 = vpack.i.bf16 %v995_v61, %v993_v58  ;;  %3254 = vst [vmem:[%s4221_s23 + $0x78] sm:$0xff] %v3127_v60   ;;  %v3207_v1 = vpack.c.bf16 %v1188_v62, %v1184_v56 }
 0x1e5   : > { %3522 = vxpose.xlu1.b32.end [16/16] %v3521_v63, 128  ;;  %v3411_v2 = vpop.trf.xlu0  ;;  %3270 = vst [vmem:[%s4221_s23 + $0xf8] sm:$0xff] %v3207_v1  }
 0x1e9   : > { %v3416_v3 = vpop.trf.xlu0 }
 0x1ed   : > { %v4267_v4 = vpop.trf.xlu0 }
 0x1ee   : > { %3742 = shalt.err (!%p3739_p2)
}
 0x1ef   : > { %s3743_s14 = scalar_lea.hbm %s4262_s7, 4096  ;;  %s3747_s22 = scalar_lea.hbm %s4469_s2, 8192 }
 0x1f0   : > { %p3744_p6 = scmp.ne.s32.totalorder %s4262_s7, %s3743_s14  ;;  %p3748_p11 = scmp.lt.s32.totalorder %s4262_s7, %s4469_s2 }
 0x1f1   : > { %p3749_p1 = scmp.lt.s32.totalorder %s3747_s22, %s3743_s14 }
 0x1f2   : > { %p3745_p9 = pnand %p3744_p6, %p3995_p0 }
 0x1f3   : > { %p3750_p8 = por %p3749_p1, %p3748_p11 }
 0x1f4   : > { %p3746_p13 = pneg %p3745_p9 }
 0x1f6   : > { %p3751_p4 = pnand %p3750_p8, %p3746_p13 }
 0x1f8   : > { %3754 = shalt.err (!%p3751_p4)
}
 0x1f9   : > { %s3879_s9 = smov 64   ;;  %s3880_s18 = smov 4   ;;  %v3426_v5 = vpop.trf.xlu0  ;;  %v3415_v18 = vunpack.i.h.bf16 %v3411_v2  ;;  %v3412_v19 = vunpack.i.l.bf16 %v3411_v2  ;;  %v3420_v27 = vunpack.i.h.bf16 %v3416_v3  ;;  %v3417_v28 = vunpack.i.l.bf16 %v3416_v3 }
 0x1fa   : > { %3293 = dma.vmem_to_hbm [thread:$0]  (%p3995_p0), %s4265_s8, 4096, %s4262_s7, %s2187_s12, %s3879_s9, %s3879_s9, %s3880_s18   ;;  %v3425_v35 = vunpack.i.h.bf16 %v4267_v4  ;;  %v3422_v36 = vunpack.i.l.bf16 %v4267_v4  ;;  %v3430_v39 = vunpack.i.h.bf16 %v3426_v5  ;;  %v3427_v40 = vunpack.i.l.bf16 %v3426_v5 }
 0x1fb   : > { %s4318_s13 = scalar_lea.vmem [#allocation8], %s4026_s28  ;;  %s2191_s28 = sand.u32 1, %s3941_s21  }
 0x1fc   : > { %s2230_s7 = sshll.u32 %s4318_s13, 4  ;;  %s2248_s8 = sshll.u32 %s4221_s23, 4  ;;  %s4383_s7 = int_to_ptr.vmem [resolvable:$true] %s2230_s7  ;;  %s4391_s8 = int_to_ptr.vmem [resolvable:$true] %s2248_s8 }
 0x1fd   : > { %v3431_v6 = vpop.trf.xlu0  ;;  %s4381_s21 = scalar_lea.hbm %s4470_s3, %s4256_s25  ;;  %s4389_s1 = scalar_lea.hbm %s4471_s4, %s4256_s25 }
 0x1fe   : > { %v3435_v45 = vunpack.i.h.bf16 %v3431_v6  ;;  %v3432_v46 = vunpack.i.l.bf16 %v3431_v6  ;;  %s4395_s23 = scalar_lea.sflag [#allocation9], %s2191_s28  ;;  %s3755_s30 = scalar_lea.vmem %s4383_s7, 4096 }
 0x1ff   : > { %p3756_p10 = scmp.ne.s32.totalorder %s4383_s7, %s3755_s30  ;;  %s3881_s22 = smov [#allocation8]  }
 0x200   : > { %s3759_s5 = sshll.u32 %s3881_s22, 4  ;;  %s3760_s5 = int_to_ptr.vmem [resolvable:$false] %s3759_s5 }
 0x201   : > { %v4295_v7 = vpop.trf.xlu0  ;;  %p3757_p12 = pnand %p3756_p10, %p3995_p0  ;;  %s3761_s6 = scalar_lea.vmem %s3760_s5, 8192 }
 0x202   : > { %v3440_v52 = vunpack.i.h.bf16 %v4295_v7  ;;  %v3437_v53 = vunpack.i.l.bf16 %v4295_v7  ;;  %p3762_p5 = scmp.lt.s32.totalorder %s4383_s7, %s3760_s5  ;;  %p3763_p7 = scmp.lt.s32.totalorder %s3761_s6, %s3755_s30 }
 0x203   : > { %p3758_p3 = pneg %p3757_p12 }
 0x204   : > { %p3764_p2 = por %p3763_p7, %p3762_p5 }
 0x205   : > { %v4297_v8 = vpop.trf.xlu0 }
 0x206   : > { %v3445_v59 = vunpack.i.h.bf16 %v4297_v8  ;;  %v3442_v60 = vunpack.i.l.bf16 %v4297_v8  ;;  %p3765_p6 = pnand %p3764_p2, %p3758_p3 }
 0x209   : > { %v4299_v9 = vpop.trf.xlu0 }
 0x20a   : > { %v3450_v3 = vunpack.i.h.bf16 %v4299_v9  ;;  %v3447_v4 = vunpack.i.l.bf16 %v4299_v9 }
 0x20d   : > { %v4301_v10 = vpop.trf.xlu0 }
 0x211   : > { %v4303_v11 = vpop.trf.xlu0 }
 0x215   : > { %v4305_v12 = vpop.trf.xlu0 }
 0x219   : > { %v4307_v13 = vpop.trf.xlu0 }
 0x21d   : > { %v4309_v14 = vpop.trf.xlu0 }
 0x221   : > { %v4311_v15 = vpop.trf.xlu0 }
 0x225   : > { %v4313_v16 = vpop.trf.xlu0  ;;  %v3523_v20 = vpop.trf.xlu1 }
 0x226   : > { %v3527_v21 = vunpack.i.h.bf16 %v3523_v20  ;;  %v3524_v23 = vunpack.i.l.bf16 %v3523_v20  ;;  %v3452_v20 = vunpack.i.l.bf16 %v4301_v10 }
 0x228   : > { %v2806_v24 = vpack.c.bf16 %v3527_v21, %v3415_v18  ;;  %v2790_v26 = vpack.c.bf16 %v3524_v23, %v3412_v19  ;;  %v3455_v19 = vunpack.i.h.bf16 %v4301_v10 }
 0x229   : > { %v4315_v17 = vpop.trf.xlu0  ;;  %v3528_v29 = vpop.trf.xlu1 }
 0x22a   : > { %2602 = vst [vmem:[%s4318_s13 + $0x80] sm:$0xff] %v2806_v24  ;;  %1736 = vst [vmem:[%s4318_s13] sm:$0xff] %v2790_v26  ;;  %v3532_v30 = vunpack.i.h.bf16 %v3528_v29  ;;  %v3529_v31 = vunpack.i.l.bf16 %v3528_v29 }
 0x22c   : > { %v2807_v32 = vpack.c.bf16 %v3532_v30, %v3420_v27  ;;  %v2791_v33 = vpack.c.bf16 %v3529_v31, %v3417_v28  ;;  %v3460_v27 = vunpack.i.h.bf16 %v4303_v11  ;;  %v3457_v28 = vunpack.i.l.bf16 %v4303_v11 }
 0x22d   : > { %v3533_v22 = vpop.trf.xlu1 }
 0x22e   : > { %2603 = vst [vmem:[%s4318_s13 + $0x88] sm:$0xff] %v2807_v32  ;;  %1737 = vst [vmem:[%s4318_s13 + $0x8] sm:$0xff] %v2791_v33  ;;  %v3537_v25 = vunpack.i.h.bf16 %v3533_v22  ;;  %v3534_v34 = vunpack.i.l.bf16 %v3533_v22  ;;  %v3465_v33 = vunpack.i.h.bf16 %v4305_v12 }
 0x230   : > { %v2808_v37 = vpack.c.bf16 %v3537_v25, %v3425_v35  ;;  %v2792_v38 = vpack.c.bf16 %v3534_v34, %v3422_v36  ;;  %v3462_v35 = vunpack.i.l.bf16 %v4305_v12 }
 0x231   : > { %v3538_v41 = vpop.trf.xlu1 }
 0x232   : > { %2604 = vst [vmem:[%s4318_s13 + $0x90] sm:$0xff] %v2808_v37  ;;  %1738 = vst [vmem:[%s4318_s13 + $0x10] sm:$0xff] %v2792_v38  ;;  %v3542_v42 = vunpack.i.h.bf16 %v3538_v41  ;;  %v3539_v43 = vunpack.i.l.bf16 %v3538_v41  ;;  %v3470_v37 = vunpack.i.h.bf16 %v4307_v13  ;;  %v3467_v38 = vunpack.i.l.bf16 %v4307_v13 }
 0x234   : > { %v2809_v0 = vpack.c.bf16 %v3542_v42, %v3430_v39  ;;  %v2793_v44 = vpack.c.bf16 %v3539_v43, %v3427_v40  ;;  %v3475_v43 = vunpack.i.h.bf16 %v4309_v14 }
 0x235   : > { %v3543_v47 = vpop.trf.xlu1 }
 0x236   : > { %2605 = vst [vmem:[%s4318_s13 + $0x98] sm:$0xff] %v2809_v0  ;;  %1739 = vst [vmem:[%s4318_s13 + $0x18] sm:$0xff] %v2793_v44  ;;  %v3547_v48 = vunpack.i.h.bf16 %v3543_v47  ;;  %v3544_v49 = vunpack.i.l.bf16 %v3543_v47  ;;  %v3472_v0 = vunpack.i.l.bf16 %v4309_v14 }
 0x238   : > { %v2810_v50 = vpack.c.bf16 %v3547_v48, %v3435_v45  ;;  %v2794_v51 = vpack.c.bf16 %v3544_v49, %v3432_v46  ;;  %v3480_v48 = vunpack.i.h.bf16 %v4311_v15  ;;  %v3477_v49 = vunpack.i.l.bf16 %v4311_v15 }
 0x239   : > { %v3548_v54 = vpop.trf.xlu1 }
 0x23a   : > { %2606 = vst [vmem:[%s4318_s13 + $0xa0] sm:$0xff] %v2810_v50  ;;  %1740 = vst [vmem:[%s4318_s13 + $0x20] sm:$0xff] %v2794_v51  ;;  %v3552_v55 = vunpack.i.h.bf16 %v3548_v54  ;;  %v3549_v56 = vunpack.i.l.bf16 %v3548_v54  ;;  %v3485_v54 = vunpack.i.h.bf16 %v4313_v16 }
 0x23c   : > { %v2811_v57 = vpack.c.bf16 %v3552_v55, %v3440_v52  ;;  %v2795_v58 = vpack.c.bf16 %v3549_v56, %v3437_v53  ;;  %v3482_v55 = vunpack.i.l.bf16 %v4313_v16 }
 0x23d   : > { %v3553_v61 = vpop.trf.xlu1 }
 0x23e   : > { %2607 = vst [vmem:[%s4318_s13 + $0xa8] sm:$0xff] %v2811_v57  ;;  %1741 = vst [vmem:[%s4318_s13 + $0x28] sm:$0xff] %v2795_v58  ;;  %v3557_v62 = vunpack.i.h.bf16 %v3553_v61  ;;  %v3554_v63 = vunpack.i.l.bf16 %v3553_v61  ;;  %v3487_v61 = vunpack.i.l.bf16 %v4315_v17 }
 0x240   : > { %v2812_v1 = vpack.c.bf16 %v3557_v62, %v3445_v59  ;;  %v2796_v2 = vpack.c.bf16 %v3554_v63, %v3442_v60  ;;  %v3490_v60 = vunpack.i.h.bf16 %v4315_v17 }
 0x241   : > { %v3558_v5 = vpop.trf.xlu1 }
 0x242   : > { %2608 = vst [vmem:[%s4318_s13 + $0xb0] sm:$0xff] %v2812_v1  ;;  %1742 = vst [vmem:[%s4318_s13 + $0x30] sm:$0xff] %v2796_v2  ;;  %v3562_v6 = vunpack.i.h.bf16 %v3558_v5  ;;  %v3559_v7 = vunpack.i.l.bf16 %v3558_v5 }
 0x244   : > { %v2813_v8 = vpack.c.bf16 %v3562_v6, %v3450_v3  ;;  %v2797_v18 = vpack.c.bf16 %v3559_v7, %v3447_v4 }
 0x245   : > { %v3563_v21 = vpop.trf.xlu1 }
 0x246   : > { %2609 = vst [vmem:[%s4318_s13 + $0xb8] sm:$0xff] %v2813_v8  ;;  %1743 = vst [vmem:[%s4318_s13 + $0x38] sm:$0xff] %v2797_v18  ;;  %v3567_v23 = vunpack.i.h.bf16 %v3563_v21  ;;  %v3564_v24 = vunpack.i.l.bf16 %v3563_v21 }
 0x248   : > { %v2814_v9 = vpack.c.bf16 %v3567_v23, %v3455_v19  ;;  %v2798_v26 = vpack.c.bf16 %v3564_v24, %v3452_v20 }
 0x249   : > { %v3568_v29 = vpop.trf.xlu1 }
 0x24a   : > { %2610 = vst [vmem:[%s4318_s13 + $0xc0] sm:$0xff] %v2814_v9  ;;  %1744 = vst [vmem:[%s4318_s13 + $0x40] sm:$0xff] %v2798_v26  ;;  %v3572_v30 = vunpack.i.h.bf16 %v3568_v29  ;;  %v3569_v31 = vunpack.i.l.bf16 %v3568_v29 }
 0x24c   : > { %v2815_v10 = vpack.c.bf16 %v3572_v30, %v3460_v27  ;;  %v2799_v32 = vpack.c.bf16 %v3569_v31, %v3457_v28 }
 0x24d   : > { %v3573_v36 = vpop.trf.xlu1 }
 0x24e   : > { %2611 = vst [vmem:[%s4318_s13 + $0xc8] sm:$0xff] %v2815_v10  ;;  %1745 = vst [vmem:[%s4318_s13 + $0x48] sm:$0xff] %v2799_v32  ;;  %v3577_v22 = vunpack.i.h.bf16 %v3573_v36  ;;  %v3574_v25 = vunpack.i.l.bf16 %v3573_v36 }
 0x250   : > { %v2816_v11 = vpack.c.bf16 %v3577_v22, %v3465_v33  ;;  %v2800_v34 = vpack.c.bf16 %v3574_v25, %v3462_v35 }
 0x251   : > { %v3578_v39 = vpop.trf.xlu1 }
 0x252   : > { %2612 = vst [vmem:[%s4318_s13 + $0xd0] sm:$0xff] %v2816_v11  ;;  %1746 = vst [vmem:[%s4318_s13 + $0x50] sm:$0xff] %v2800_v34  ;;  %v3582_v40 = vunpack.i.h.bf16 %v3578_v39  ;;  %v3579_v41 = vunpack.i.l.bf16 %v3578_v39 }
 0x254   : > { %v2817_v12 = vpack.c.bf16 %v3582_v40, %v3470_v37  ;;  %v2801_v42 = vpack.c.bf16 %v3579_v41, %v3467_v38 }
 0x255   : > { %v3583_v44 = vpop.trf.xlu1 }
 0x256   : > { %2613 = vst [vmem:[%s4318_s13 + $0xd8] sm:$0xff] %v2817_v12  ;;  %1747 = vst [vmem:[%s4318_s13 + $0x58] sm:$0xff] %v2801_v42  ;;  %v3587_v45 = vunpack.i.h.bf16 %v3583_v44  ;;  %v3584_v46 = vunpack.i.l.bf16 %v3583_v44 }
 0x258   : > { %v2818_v13 = vpack.c.bf16 %v3587_v45, %v3475_v43  ;;  %v2802_v47 = vpack.c.bf16 %v3584_v46, %v3472_v0 }
 0x259   : > { %v3588_v50 = vpop.trf.xlu1 }
 0x25a   : > { %2614 = vst [vmem:[%s4318_s13 + $0xe0] sm:$0xff] %v2818_v13  ;;  %1748 = vst [vmem:[%s4318_s13 + $0x60] sm:$0xff] %v2802_v47  ;;  %v3592_v51 = vunpack.i.h.bf16 %v3588_v50  ;;  %v3589_v52 = vunpack.i.l.bf16 %v3588_v50 }
 0x25c   : > { %v2819_v14 = vpack.c.bf16 %v3592_v51, %v3480_v48  ;;  %v2803_v53 = vpack.c.bf16 %v3589_v52, %v3477_v49 }
 0x25d   : > { %v3593_v56 = vpop.trf.xlu1 }
 0x25e   : > { %2615 = vst [vmem:[%s4318_s13 + $0xe8] sm:$0xff] %v2819_v14  ;;  %1749 = vst [vmem:[%s4318_s13 + $0x68] sm:$0xff] %v2803_v53  ;;  %v3597_v15 = vunpack.i.h.bf16 %v3593_v56  ;;  %v3594_v57 = vunpack.i.l.bf16 %v3593_v56 }
 0x260   : > { %v2820_v58 = vpack.c.bf16 %v3597_v15, %v3485_v54  ;;  %v2804_v59 = vpack.c.bf16 %v3594_v57, %v3482_v55 }
 0x261   : > { %v3598_v62 = vpop.trf.xlu1 }
 0x262   : > { %2616 = vst [vmem:[%s4318_s13 + $0xf0] sm:$0xff] %v2820_v58  ;;  %1750 = vst [vmem:[%s4318_s13 + $0x70] sm:$0xff] %v2804_v59  ;;  %v3602_v16 = vunpack.i.h.bf16 %v3598_v62  ;;  %v3599_v63 = vunpack.i.l.bf16 %v3598_v62 }
 0x264   : > { %v2821_v1 = vpack.c.bf16 %v3602_v16, %v3490_v60  ;;  %v2805_v2 = vpack.c.bf16 %v3599_v63, %v3487_v61 }
 0x266   : > { %2617 = vst [vmem:[%s4318_s13 + $0xf8] sm:$0xff] %v2821_v1  ;;  %1751 = vst [vmem:[%s4318_s13 + $0x78] sm:$0xff] %v2805_v2 }
 0x267   : > { %3768 = shalt.err (!%p3765_p6)
}
 0x268   : > { %s3769_s25 = scalar_lea.hbm %s4381_s21, 4096  ;;  %s3773_s12 = scalar_lea.hbm %s4470_s3, 8192 }
 0x269   : > { %p3770_p9 = scmp.ne.s32.totalorder %s4381_s21, %s3769_s25  ;;  %p3774_p1 = scmp.lt.s32.totalorder %s4381_s21, %s4470_s3 }
 0x26a   : > { %p3775_p8 = scmp.lt.s32.totalorder %s3773_s12, %s3769_s25 }
 0x26b   : > { %p3771_p13 = pnand %p3770_p9, %p3995_p0 }
 0x26c   : > { %p3776_p4 = por %p3775_p8, %p3774_p1 }
 0x26d   : > { %p3772_p11 = pneg %p3771_p13 }
 0x26f   : > { %p3777_p10 = pnand %p3776_p4, %p3772_p11 }
 0x271   : > { %3780 = shalt.err (!%p3777_p10)
}
 0x272   : > { %s3882_s14 = smov 128   ;;  %s3883_s30 = smov 8  }
 0x273   : > { %3294 = dma.vmem_to_hbm [thread:$0]  (%p3995_p0), %s4383_s7, 4096, %s4381_s21, %s4395_s23, %s3882_s14, %s3882_s14, %s3883_s30  }
 0x274   : > { %s3781_s22 = scalar_lea.vmem %s4391_s8, 4096  ;;  %s3884_s5 = smov [#allocation10]  }
 0x275   : > { %p3782_p12 = scmp.ne.s32.totalorder %s4391_s8, %s3781_s22  ;;  %s3785_s6 = sshll.u32 %s3884_s5, 4  ;;  %s3786_s6 = int_to_ptr.vmem [resolvable:$false] %s3785_s6 }
 0x276   : > { %s3787_s25 = scalar_lea.vmem %s3786_s6, 8192  ;;  %p3788_p7 = scmp.lt.s32.totalorder %s4391_s8, %s3786_s6 }
 0x277   : > { %p3783_p3 = pnand %p3782_p12, %p3995_p0  ;;  %p3789_p2 = scmp.lt.s32.totalorder %s3787_s25, %s3781_s22 }
 0x279   : > { %p3784_p5 = pneg %p3783_p3  ;;  %p3790_p6 = por %p3789_p2, %p3788_p7 }
 0x27b   : > { %p3791_p9 = pnand %p3790_p6, %p3784_p5 }
 0x27d   : > { %3794 = shalt.err (!%p3791_p9)
}
 0x27e   : > { %s3795_s13 = scalar_lea.hbm %s4389_s1, 4096  ;;  %s3799_s28 = scalar_lea.hbm %s4471_s4, 8192 }
 0x27f   : > { %p3796_p13 = scmp.ne.s32.totalorder %s4389_s1, %s3795_s13  ;;  %p3800_p8 = scmp.lt.s32.totalorder %s4389_s1, %s4471_s4 }
 0x280   : > { %p3801_p4 = scmp.lt.s32.totalorder %s3799_s28, %s3795_s13 }
 0x281   : > { %p3797_p11 = pnand %p3796_p13, %p3995_p0 }
 0x282   : > { %p3802_p10 = por %p3801_p4, %p3800_p8 }
 0x283   : > { %p3798_p1 = pneg %p3797_p11 }
 0x285   : > { %p3803_p12 = pnand %p3802_p10, %p3798_p1 }
 0x287   : > { %3806 = shalt.err (!%p3803_p12)
}
 0x288   : > { %3295 = dma.vmem_to_hbm [thread:$0]  (%p3995_p0), %s4391_s8, 4096, %s4389_s1, %s4395_s23, %s3879_s9, %s3879_s9, %s3880_s18  }
 0x289 PF: > { %s2263_s10 = sand.u32 1, %s3849_s15   ;;  %p4486_p3 = scmp.ne.s32.totalorder %s4476_s24, 0 }
 0x28a   : > { %p4487_p5 = scmp.ge.s32.totalorder %s3869_s20, 2  ;;  %s2264_s14 = scalar_lea.sflag [#allocation4], %s2263_s10 }
 0x28c   : > { %p3308_p7 = pnand %p4487_p5, %p4486_p3 }
 0x28e   : > { %p3309_p2 = pneg %p3308_p7 }
 0x290   : > { %3840 = dma.done.wait (%p3309_p2), %s2264_s14, 4096  }
 0x291   : > { %3842 = vsyncadd (%p3309_p2), %s2264_s14, 4294963200  ;;  %s4488_s11 = sadd.s32 4294967294, %s3869_s20  }
 0x292   : > { %s2272_s30 = sand.u32 1, %s4488_s11  }
 0x293   : > { %s2273_s22 = scalar_lea.sflag [#allocation9], %s2272_s30 }
 0x294   : > { %3844 = dma.done.wait (%p3309_p2), %s2273_s22, 8192  }
 0x295   : > { %3846 = vsyncadd (%p3309_p2), %s2273_s22, 4294959104  ;;  %s25_s20 = sadd.s32 1, %s3869_s20   ;;  %s4489_s15 = smov %s3853_s16 }
 0x296   : > { %p22_p0 = scmp.ge.s32.totalorder %s25_s20, 4   ;;  %s4490_s16 = smov %s3857_s17 }
 0x297   : > { %s4491_s17 = smov %s4004_s26  ;;  %s4492_s18 = smov %s3865_s19 }
 0x298   : > { %s4493_s19 = smov %s4495_s29  ;;  %24 = sbr.rel (!%p22_p0) target bundleno = 11 (0xb), region = 112 }
 0x29d   :  { %2287 = vsyncpa [#allocation3], 1 }
 0x29e   :  { %2289 = vsyncpa [#allocation3 + $0x1], 1 }
 0x29f   :  { %2290 = vsyncpa [#allocation6], 1 }
 0x2a0   :  { %2291 = vsyncpa [#allocation4], 1 }
 0x2a1   :  { %2293 = vsyncpa [#allocation4 + $0x1], 1 }
 0x2a2   :  { %2294 = vsyncpa [#allocation9], 1 }
 0x2a3   :  { %2296 = vsyncpa [#allocation9 + $0x1], 1 }

</bundles_post_ra>
